<compile_context>
chip_gen: v7x
topology: tpu7x:2x2x1
jax: 0.10.0
libtpu: 0.0.40
codegen_flags: <defaults>
</compile_context>

<pallas_src>
import math
import jax
import jax.numpy as jnp
from jax import lax
from jax.experimental import pallas as pl
from jax.experimental.pallas import tpu as pltpu
import numpy as np

# ----------------------------- sizes -----------------------------
B = 4        # batch (logical)
BP = 8       # batch padded to the f32 sublane width
T = 8        # encoder input length
L = 6        # decoder (ys) length
E = 32       # embeddingsize
H = 32       # hiddensize (== psize -> o2e is identity)
H2 = 2 * H
V = 128      # num_features (vocab)
NULL_IDX = 0
END_IDX = 1
START_IDX = 2


# ----------------------- fused seq2seq kernel -----------------------
def _seq2seq_kernel(xes_ref, dxes_ref, lens_ref,
                    e_wih_rz_ref, e_wih_n_ref, e_whh_rz_ref, e_whh_n_ref,
                    e_brz_ref, e_bin_ref, e_bhn_ref,
                    d_wih_rz_ref, d_wih_n_ref, d_whh_rz_ref, d_whh_n_ref,
                    d_brz_ref, d_bin_ref, d_bhn_ref,
                    e2s_ref,
                    scores_ref, preds_ref,
                    h_sc, e_girz_sc, e_gin_sc, d_girz_sc, d_gin_sc, hall_sc):
    # xes: (T*BP, E)  dxes: (L*BP, E)  lens: (BP, 1) int32
    # W_ih pre-split/transposed: rz (E, 2H), n (E, H); W_hh: rz (H, 2H), n (H, H)
    # b_rz = b_ih[:2H] + b_hh[:2H] (1, 2H); b_in = b_ih[2H:] (1, H); b_hn = b_hh[2H:] (1, H)
    # e2s: (H, V)      scores: (L*BP, V)   preds: (L*BP, 1) int32

    # ---- hoisted input projections (off the serial dependence chain) ----
    xes = xes_ref[...]
    e_girz_sc[...] = (jnp.dot(xes, e_wih_rz_ref[...],
                              preferred_element_type=jnp.float32) + e_brz_ref[...])
    e_gin_sc[...] = (jnp.dot(xes, e_wih_n_ref[...],
                             preferred_element_type=jnp.float32) + e_bin_ref[...])

    dxes = dxes_ref[...]
    d_girz_sc[...] = (jnp.dot(dxes, d_wih_rz_ref[...],
                              preferred_element_type=jnp.float32) + d_brz_ref[...])
    d_gin_sc[...] = (jnp.dot(dxes, d_wih_n_ref[...],
                             preferred_element_type=jnp.float32) + d_bin_ref[...])

    # loop-invariant operands hoisted once
    lens = lens_ref[...]                       # (BP, 1) int32  (= xlen + 1, 0 for pad rows)
    e_whh_rz = e_whh_rz_ref[...]
    e_whh_n = e_whh_n_ref[...]
    e_bhn = e_bhn_ref[...]
    d_whh_rz = d_whh_rz_ref[...]
    d_whh_n = d_whh_n_ref[...]
    d_bhn = d_bhn_ref[...]

    # ---- encoder GRU with packed-sequence masking ----
    h_sc[...] = jnp.zeros_like(h_sc)

    def enc_step(t, carry):
        row = pl.multiple_of(t * BP, BP)
        h = h_sc[...]                                               # (BP, H)
        gh_rz = jnp.dot(h, e_whh_rz, preferred_element_type=jnp.float32)
        gh_n = jnp.dot(h, e_whh_n, preferred_element_type=jnp.float32) + e_bhn
        rz = jax.nn.sigmoid(e_girz_sc[pl.ds(row, BP), :] + gh_rz)   # (BP, 2H)
        r = rz[:, :H]
        z = rz[:, H:]
        n = jnp.tanh(e_gin_sc[pl.ds(row, BP), :] + r * gh_n)
        h_new = (1.0 - z) * n + z * h
        m_t = (lens > t).astype(jnp.float32)                        # (BP, 1)
        h_sc[...] = m_t * h_new + (1.0 - m_t) * h                   # freeze past true length
        return carry

    lax.fori_loop(0, T, enc_step, 0, unroll=True)

    # ---- decoder GRU (teacher forced); only store hidden states here ----
    def dec_step(t, carry):
        row = pl.multiple_of(t * BP, BP)
        h = h_sc[...]
        gh_rz = jnp.dot(h, d_whh_rz, preferred_element_type=jnp.float32)
        gh_n = jnp.dot(h, d_whh_n, preferred_element_type=jnp.float32) + d_bhn
        rz = jax.nn.sigmoid(d_girz_sc[pl.ds(row, BP), :] + gh_rz)
        r = rz[:, :H]
        z = rz[:, H:]
        n = jnp.tanh(d_gin_sc[pl.ds(row, BP), :] + r * gh_n)
        h_new = (1.0 - z) * n + z * h
        h_sc[...] = h_new
        hall_sc[pl.ds(row, BP), :] = h_new
        return carry

    lax.fori_loop(0, L, dec_step, 0, unroll=True)

    # ---- batched hidden_to_idx: e2s + log_softmax + argmax, single writeback ----
    logits = jnp.dot(hall_sc[...], e2s_ref[...],
                     preferred_element_type=jnp.float32)            # (L*BP, V), lane-dense
    mx = jnp.max(logits, axis=1, keepdims=True)
    lse = jnp.log(jnp.sum(jnp.exp(logits - mx), axis=1, keepdims=True)) + mx
    scores_ref[...] = logits - lse
    col = lax.broadcasted_iota(jnp.int32, (L * BP, V), 1)
    is_max = logits == mx
    preds_ref[...] = jnp.min(jnp.where(is_max, col, V),
                             axis=1, keepdims=True).astype(jnp.int32)


_N_IN = 18
_fused = pl.pallas_call(
    _seq2seq_kernel,
    out_shape=(jax.ShapeDtypeStruct((L * BP, V), jnp.float32),
               jax.ShapeDtypeStruct((L * BP, 1), jnp.int32)),
    in_specs=[pl.BlockSpec(memory_space=pltpu.MemorySpace.VMEM)] * _N_IN,
    out_specs=(pl.BlockSpec(memory_space=pltpu.MemorySpace.VMEM),
               pl.BlockSpec(memory_space=pltpu.MemorySpace.VMEM)),
    scratch_shapes=[
        pltpu.VMEM((BP, H), jnp.float32),        # h
        pltpu.VMEM((T * BP, H2), jnp.float32),   # hoisted encoder gi_rz
        pltpu.VMEM((T * BP, H), jnp.float32),    # hoisted encoder gi_n
        pltpu.VMEM((L * BP, H2), jnp.float32),   # hoisted decoder gi_rz
        pltpu.VMEM((L * BP, H), jnp.float32),    # hoisted decoder gi_n
        pltpu.VMEM((L * BP, H), jnp.float32),    # decoder hidden states
    ],
)


# ---------------------------- parameters ----------------------------
def init_params(key):
    ks = jax.random.split(key, 12)
    stdv = 1.0 / math.sqrt(H)
    u = lambda k, shape, s: jax.random.uniform(k, shape, jnp.float32, -s, s)

    lt = jax.random.normal(ks[0], (V, E), jnp.float32)
    lt = lt.at[NULL_IDX].set(0.0)                      # padding_idx row zeroed

    p = dict(
        lt=lt,
        enc_wih=u(ks[1], (3 * H, E), stdv), enc_whh=u(ks[2], (3 * H, H), stdv),
        enc_bih=u(ks[3], (3 * H,), stdv),   enc_bhh=u(ks[4], (3 * H,), stdv),
        dec_wih=u(ks[5], (3 * H, E), stdv), dec_whh=u(ks[6], (3 * H, H), stdv),
        dec_bih=u(ks[7], (3 * H,), stdv),   dec_bhh=u(ks[8], (3 * H,), stdv),
        e2s_w=u(ks[9], (V, H), 1.0 / math.sqrt(H)),    # Linear(psize, V, bias=False)
    )
    return p


# ---------------------------- forward (wrapper) ----------------------------
def _split_gru(wih, whh, bih, bhh):
    # torch GRU gate order [r, z, n]; pre-transpose to (in_dim, out_dim) and
    # fold the r/z biases into the hoisted input projection.
    return (wih[:H2].T, wih[H2:].T,              # (E, 2H), (E, H)
            whh[:H2].T, whh[H2:].T,              # (H, 2H), (H, H)
            (bih[:H2] + bhh[:H2])[None, :],      # (1, 2H)
            bih[H2:][None, :],                   # (1, H)
            bhh[H2:][None, :])                   # (1, H)


def seq2seq_forward(params, xs, xlen, ys):
    # dropout == 0 -> identity; attention disabled; o2e identity (hsz == psize)
    emb = params["lt"]
    pad_b = BP - B

    # ---- _encode inputs: embed, time-major, pad batch, flatten to (T*BP, E) ----
    xes = jnp.transpose(emb[xs], (1, 0, 2))                       # (T, B, E)
    xes = jnp.pad(xes, ((0, 0), (0, pad_b), (0, 0)))              # (T, BP, E)
    xes = xes.reshape(T * BP, E).astype(jnp.float32)
    lens = jnp.pad(xlen + 1, ((0, pad_b),)).reshape(BP, 1).astype(jnp.int32)

    # ---- decoder teacher-forcing inputs: [START, ys[:, :-1]] ----
    start_e = jnp.broadcast_to(emb[START_IDX][None, None, :], (1, B, E))
    dxes = jnp.concatenate(
        [start_e, jnp.transpose(emb[ys[:, :-1]], (1, 0, 2))], axis=0)   # (L, B, E)
    dxes = jnp.pad(dxes, ((0, 0), (0, pad_b), (0, 0)))            # (L, BP, E)
    dxes = dxes.reshape(L * BP, E).astype(jnp.float32)

    enc = _split_gru(params["enc_wih"], params["enc_whh"],
                     params["enc_bih"], params["enc_bhh"])
    dec = _split_gru(params["dec_wih"], params["dec_whh"],
                     params["dec_bih"], params["dec_bhh"])
    e2s_t = params["e2s_w"].T                                     # (H, V)

    scores2d, preds2d = _fused(xes, dxes, lens, *enc, *dec, e2s_t)
    scores = scores2d.reshape(L, BP, V)[:, :B, :]                 # (L, B, V) log-probs
    preds = preds2d.reshape(L, BP)[:, :B].T                       # (B, L) = torch.stack(preds, 1)
    return scores, preds


# TODO(synk): the free-running decode branch (ys is None, stop-at-END) is not
# implemented; this kernel covers the teacher-forced training forward path.


# ---------------------------- pure-JAX reference ----------------------------
def _gru_step(x_t, h, wih, whh, bih, bhh):
    gi = x_t @ wih.T + bih
    gh = h @ whh.T + bhh
    r = jax.nn.sigmoid(gi[:, 0:H] + gh[:, 0:H])
    z = jax.nn.sigmoid(gi[:, H:2 * H] + gh[:, H:2 * H])
    n = jnp.tanh(gi[:, 2 * H:3 * H] + r * gh[:, 2 * H:3 * H])
    return (1.0 - z) * n + z * h


def seq2seq_ref(params, xs, xlen, ys):
    emb = params["lt"]
    xes = jnp.transpose(emb[xs], (1, 0, 2))
    h = jnp.zeros((B, H), jnp.float32)
    for t in range(T):
        m = (t < xlen + 1).astype(jnp.float32)[:, None]
        h_new = _gru_step(xes[t], h, params["enc_wih"], params["enc_whh"],
                          params["enc_bih"], params["enc_bhh"])
        h = m * h_new + (1.0 - m) * h
    dec_in = jnp.concatenate(
        [jnp.broadcast_to(emb[START_IDX][None, None, :], (1, B, E)),
         jnp.transpose(emb[ys[:, :-1]], (1, 0, 2))], axis=0)
    scores, preds = [], []
    for t in range(L):
        h = _gru_step(dec_in[t], h, params["dec_wih"], params["dec_whh"],
                      params["dec_bih"], params["dec_bhh"])
        logits = h @ params["e2s_w"].T
        logp = jax.nn.log_softmax(logits, axis=1)
        scores.append(logp)
        preds.append(jnp.argmax(logp, axis=1))
    return jnp.stack(scores, 0), jnp.stack(preds, 1)


# ---------------------------------- main ----------------------------------
if __name__ == "__main__":
    key = jax.random.PRNGKey(0)
    pkey, xkey, ykey = jax.random.split(key, 3)
    params = init_params(pkey)

    # inputs: padded token ids (descending lengths, as pack_padded_sequence requires)
    xlen = jnp.array([7, 6, 5, 5], dtype=jnp.int32)          # true lengths are xlen + 1
    xs = jax.random.randint(xkey, (B, T), 3, V, dtype=jnp.int32)
    pad_mask = jnp.arange(T)[None, :] < (xlen + 1)[:, None]
    xs = jnp.where(pad_mask, xs, NULL_IDX)
    ys = jax.random.randint(ykey, (B, L), 1, V, dtype=jnp.int32)

    fwd = jax.jit(seq2seq_forward)
    scores, preds = fwd(params, xs, xlen, ys)
    scores = jax.block_until_ready(scores)
    preds = jax.block_until_ready(preds)

    # silent correctness check against a pure-JAX reference
    ref_scores, ref_preds = seq2seq_ref(params, xs, xlen, ys)
    np.testing.assert_allclose(np.asarray(scores), np.asarray(ref_scores),
                               rtol=1e-4, atol=1e-4)
    np.testing.assert_array_equal(np.asarray(preds), np.asarray(ref_preds))

    print("KERNEL_OK")
</pallas_src>

<mosaic_0001>
module attributes {stable_mosaic.version = 11 : i64} {
  func.func @_seq2seq_kernel(%arg0: memref<64x32xf32, #tpu.memory_space<vmem>>, %arg1: memref<48x32xf32, #tpu.memory_space<vmem>>, %arg2: memref<8x1xi32, #tpu.memory_space<vmem>>, %arg3: memref<32x64xf32, #tpu.memory_space<vmem>>, %arg4: memref<32x32xf32, #tpu.memory_space<vmem>>, %arg5: memref<32x64xf32, #tpu.memory_space<vmem>>, %arg6: memref<32x32xf32, #tpu.memory_space<vmem>>, %arg7: memref<1x64xf32, #tpu.memory_space<vmem>>, %arg8: memref<1x32xf32, #tpu.memory_space<vmem>>, %arg9: memref<1x32xf32, #tpu.memory_space<vmem>>, %arg10: memref<32x64xf32, #tpu.memory_space<vmem>>, %arg11: memref<32x32xf32, #tpu.memory_space<vmem>>, %arg12: memref<32x64xf32, #tpu.memory_space<vmem>>, %arg13: memref<32x32xf32, #tpu.memory_space<vmem>>, %arg14: memref<1x64xf32, #tpu.memory_space<vmem>>, %arg15: memref<1x32xf32, #tpu.memory_space<vmem>>, %arg16: memref<1x32xf32, #tpu.memory_space<vmem>>, %arg17: memref<32x128xf32, #tpu.memory_space<vmem>>, %arg18: memref<48x128xf32, #tpu.memory_space<vmem>>, %arg19: memref<48x1xi32, #tpu.memory_space<vmem>>, %arg20: memref<8x32xf32, #tpu.memory_space<vmem>>, %arg21: memref<64x64xf32, #tpu.memory_space<vmem>>, %arg22: memref<64x32xf32, #tpu.memory_space<vmem>>, %arg23: memref<48x64xf32, #tpu.memory_space<vmem>>, %arg24: memref<48x32xf32, #tpu.memory_space<vmem>>, %arg25: memref<48x32xf32, #tpu.memory_space<vmem>>) attributes {dimension_semantics = [], scalar_prefetch = 0 : i64, scratch_operands = 6 : i64, tpu.core_type = #tpu.core_type<tc>} {
    %c0 = arith.constant 0 : index
    %c0_0 = arith.constant 0 : index
    %0 = vector.load %arg0[%c0, %c0_0] : memref<64x32xf32, #tpu.memory_space<vmem>>, vector<64x32xf32>
    %c0_1 = arith.constant 0 : index
    %c0_2 = arith.constant 0 : index
    %1 = vector.load %arg3[%c0_1, %c0_2] : memref<32x64xf32, #tpu.memory_space<vmem>>, vector<32x64xf32>
    %cst = arith.constant dense<0.000000e+00> : vector<64x64xf32>
    %2 = tpu.matmul %0, %1, %cst {dimension_numbers = #tpu.dot_dimension_numbers<[1], [0], [0], [1], [0, 0, 1, 1], [], []>} : vector<64x32xf32>, vector<32x64xf32>, vector<64x64xf32> -> vector<64x64xf32>
    %c0_3 = arith.constant 0 : index
    %c0_4 = arith.constant 0 : index
    %3 = vector.load %arg7[%c0_3, %c0_4] : memref<1x64xf32, #tpu.memory_space<vmem>>, vector<1x64xf32>
    %4 = vector.broadcast %3 : vector<1x64xf32> to vector<64x64xf32>
    %5 = arith.addf %2, %4 : vector<64x64xf32>
    %c0_5 = arith.constant 0 : index
    %c0_6 = arith.constant 0 : index
    %6 = vector.load %arg21[%c0_5, %c0_6] : memref<64x64xf32, #tpu.memory_space<vmem>>, vector<64x64xf32>
    tpu.vector_store %arg21[%c0_5, %c0_6], %5 {strides = array<i32>} : memref<64x64xf32, #tpu.memory_space<vmem>>, vector<64x64xf32>,
    %c0_7 = arith.constant 0 : index
    %c0_8 = arith.constant 0 : index
    %7 = vector.load %arg4[%c0_7, %c0_8] : memref<32x32xf32, #tpu.memory_space<vmem>>, vector<32x32xf32>
    %cst_9 = arith.constant dense<0.000000e+00> : vector<64x32xf32>
    %8 = tpu.matmul %0, %7, %cst_9 {dimension_numbers = #tpu.dot_dimension_numbers<[1], [0], [0], [1], [0, 0, 1, 1], [], []>} : vector<64x32xf32>, vector<32x32xf32>, vector<64x32xf32> -> vector<64x32xf32>
    %c0_10 = arith.constant 0 : index
    %c0_11 = arith.constant 0 : index
    %9 = vector.load %arg8[%c0_10, %c0_11] : memref<1x32xf32, #tpu.memory_space<vmem>>, vector<1x32xf32>
    %10 = vector.broadcast %9 : vector<1x32xf32> to vector<64x32xf32>
    %11 = arith.addf %8, %10 : vector<64x32xf32>
    %c0_12 = arith.constant 0 : index
    %c0_13 = arith.constant 0 : index
    %12 = vector.load %arg22[%c0_12, %c0_13] : memref<64x32xf32, #tpu.memory_space<vmem>>, vector<64x32xf32>
    tpu.vector_store %arg22[%c0_12, %c0_13], %11 {strides = array<i32>} : memref<64x32xf32, #tpu.memory_space<vmem>>, vector<64x32xf32>,
    %c0_14 = arith.constant 0 : index
    %c0_15 = arith.constant 0 : index
    %13 = vector.load %arg1[%c0_14, %c0_15] : memref<48x32xf32, #tpu.memory_space<vmem>>, vector<48x32xf32>
    %c0_16 = arith.constant 0 : index
    %c0_17 = arith.constant 0 : index
    %14 = vector.load %arg10[%c0_16, %c0_17] : memref<32x64xf32, #tpu.memory_space<vmem>>, vector<32x64xf32>
    %cst_18 = arith.constant dense<0.000000e+00> : vector<48x64xf32>
    %15 = tpu.matmul %13, %14, %cst_18 {dimension_numbers = #tpu.dot_dimension_numbers<[1], [0], [0], [1], [0, 0, 1, 1], [], []>} : vector<48x32xf32>, vector<32x64xf32>, vector<48x64xf32> -> vector<48x64xf32>
    %c0_19 = arith.constant 0 : index
    %c0_20 = arith.constant 0 : index
    %16 = vector.load %arg14[%c0_19, %c0_20] : memref<1x64xf32, #tpu.memory_space<vmem>>, vector<1x64xf32>
    %17 = vector.broadcast %16 : vector<1x64xf32> to vector<48x64xf32>
    %18 = arith.addf %15, %17 : vector<48x64xf32>
    %c0_21 = arith.constant 0 : index
    %c0_22 = arith.constant 0 : index
    %19 = vector.load %arg23[%c0_21, %c0_22] : memref<48x64xf32, #tpu.memory_space<vmem>>, vector<48x64xf32>
    tpu.vector_store %arg23[%c0_21, %c0_22], %18 {strides = array<i32>} : memref<48x64xf32, #tpu.memory_space<vmem>>, vector<48x64xf32>,
    %c0_23 = arith.constant 0 : index
    %c0_24 = arith.constant 0 : index
    %20 = vector.load %arg11[%c0_23, %c0_24] : memref<32x32xf32, #tpu.memory_space<vmem>>, vector<32x32xf32>
    %cst_25 = arith.constant dense<0.000000e+00> : vector<48x32xf32>
    %21 = tpu.matmul %13, %20, %cst_25 {dimension_numbers = #tpu.dot_dimension_numbers<[1], [0], [0], [1], [0, 0, 1, 1], [], []>} : vector<48x32xf32>, vector<32x32xf32>, vector<48x32xf32> -> vector<48x32xf32>
    %c0_26 = arith.constant 0 : index
    %c0_27 = arith.constant 0 : index
    %22 = vector.load %arg15[%c0_26, %c0_27] : memref<1x32xf32, #tpu.memory_space<vmem>>, vector<1x32xf32>
    %23 = vector.broadcast %22 : vector<1x32xf32> to vector<48x32xf32>
    %24 = arith.addf %21, %23 : vector<48x32xf32>
    %c0_28 = arith.constant 0 : index
    %c0_29 = arith.constant 0 : index
    %25 = vector.load %arg24[%c0_28, %c0_29] : memref<48x32xf32, #tpu.memory_space<vmem>>, vector<48x32xf32>
    tpu.vector_store %arg24[%c0_28, %c0_29], %24 {strides = array<i32>} : memref<48x32xf32, #tpu.memory_space<vmem>>, vector<48x32xf32>,
    %c0_30 = arith.constant 0 : index
    %c0_31 = arith.constant 0 : index
    %26 = vector.load %arg2[%c0_30, %c0_31] : memref<8x1xi32, #tpu.memory_space<vmem>>, vector<8x1xi32>
    %c0_32 = arith.constant 0 : index
    %c0_33 = arith.constant 0 : index
    %27 = vector.load %arg5[%c0_32, %c0_33] : memref<32x64xf32, #tpu.memory_space<vmem>>, vector<32x64xf32>
    %c0_34 = arith.constant 0 : index
    %c0_35 = arith.constant 0 : index
    %28 = vector.load %arg6[%c0_34, %c0_35] : memref<32x32xf32, #tpu.memory_space<vmem>>, vector<32x32xf32>
    %c0_36 = arith.constant 0 : index
    %c0_37 = arith.constant 0 : index
    %29 = vector.load %arg9[%c0_36, %c0_37] : memref<1x32xf32, #tpu.memory_space<vmem>>, vector<1x32xf32>
    %c0_38 = arith.constant 0 : index
    %c0_39 = arith.constant 0 : index
    %30 = vector.load %arg12[%c0_38, %c0_39] : memref<32x64xf32, #tpu.memory_space<vmem>>, vector<32x64xf32>
    %c0_40 = arith.constant 0 : index
    %c0_41 = arith.constant 0 : index
    %31 = vector.load %arg13[%c0_40, %c0_41] : memref<32x32xf32, #tpu.memory_space<vmem>>, vector<32x32xf32>
    %c0_42 = arith.constant 0 : index
    %c0_43 = arith.constant 0 : index
    %32 = vector.load %arg16[%c0_42, %c0_43] : memref<1x32xf32, #tpu.memory_space<vmem>>, vector<1x32xf32>
    %cst_44 = arith.constant 0.000000e+00 : f32
    %33 = vector.broadcast %cst_44 : f32 to vector<8x32xf32>
    %c0_45 = arith.constant 0 : index
    %c0_46 = arith.constant 0 : index
    %34 = vector.load %arg20[%c0_45, %c0_46] : memref<8x32xf32, #tpu.memory_space<vmem>>, vector<8x32xf32>
    tpu.vector_store %arg20[%c0_45, %c0_46], %33 {strides = array<i32>} : memref<8x32xf32, #tpu.memory_space<vmem>>, vector<8x32xf32>,
    %c0_i32 = arith.constant 0 : i32
    %c8_i32 = arith.constant 8 : i32
    %35 = arith.muli %c0_i32, %c8_i32 : i32
    %36 = tpu.assume_multiple %35, 8 : i32
    %c0_47 = arith.constant 0 : index
    %c0_48 = arith.constant 0 : index
    %37 = vector.load %arg20[%c0_47, %c0_48] : memref<8x32xf32, #tpu.memory_space<vmem>>, vector<8x32xf32>
    %cst_49 = arith.constant dense<0.000000e+00> : vector<8x64xf32>
    %38 = tpu.matmul %37, %27, %cst_49 {dimension_numbers = #tpu.dot_dimension_numbers<[1], [0], [0], [1], [0, 0, 1, 1], [], []>} : vector<8x32xf32>, vector<32x64xf32>, vector<8x64xf32> -> vector<8x64xf32>
    %cst_50 = arith.constant dense<0.000000e+00> : vector<8x32xf32>
    %39 = tpu.matmul %37, %28, %cst_50 {dimension_numbers = #tpu.dot_dimension_numbers<[1], [0], [0], [1], [0, 0, 1, 1], [], []>} : vector<8x32xf32>, vector<32x32xf32>, vector<8x32xf32> -> vector<8x32xf32>
    %40 = vector.broadcast %29 : vector<1x32xf32> to vector<8x32xf32>
    %41 = arith.addf %39, %40 : vector<8x32xf32>
    %42 = arith.index_cast %36 : i32 to index
    %c0_51 = arith.constant 0 : index
    %43 = vector.load %arg21[%42, %c0_51] : memref<64x64xf32, #tpu.memory_space<vmem>>, vector<8x64xf32>
    %44 = arith.addf %43, %38 : vector<8x64xf32>
    %45 = arith.negf %44 : vector<8x64xf32>
    %46 = math.exp %45 : vector<8x64xf32>
    %cst_52 = arith.constant 1.000000e+00 : f32
    %47 = vector.broadcast %cst_52 : f32 to vector<8x64xf32>
    %48 = arith.addf %47, %46 : vector<8x64xf32>
    %49 = arith.divf %47, %48 : vector<8x64xf32>
    %50 = vector.extract_strided_slice %49 {offsets = [0, 0], sizes = [8, 32], strides = [1, 1]} : vector<8x64xf32> to vector<8x32xf32>
    %51 = vector.extract_strided_slice %49 {offsets = [0, 32], sizes = [8, 32], strides = [1, 1]} : vector<8x64xf32> to vector<8x32xf32>
    %52 = arith.index_cast %36 : i32 to index
    %c0_53 = arith.constant 0 : index
    %53 = vector.load %arg22[%52, %c0_53] : memref<64x32xf32, #tpu.memory_space<vmem>>, vector<8x32xf32>
    %54 = arith.mulf %50, %41 : vector<8x32xf32>
    %55 = arith.addf %53, %54 : vector<8x32xf32>
    %56 = math.tanh %55 : vector<8x32xf32>
    %cst_54 = arith.constant 1.000000e+00 : f32
    %57 = vector.broadcast %cst_54 : f32 to vector<8x32xf32>
    %58 = arith.subf %57, %51 : vector<8x32xf32>
    %59 = arith.mulf %58, %56 : vector<8x32xf32>
    %60 = arith.mulf %51, %37 : vector<8x32xf32>
    %61 = arith.addf %59, %60 : vector<8x32xf32>
    %62 = vector.broadcast %c0_i32 : i32 to vector<8x1xi32>
    %63 = arith.cmpi sgt, %26, %62 : vector<8x1xi32>
    %64 = arith.extui %63 : vector<8x1xi1> to vector<8x1xi32>
    %65 = arith.sitofp %64 : vector<8x1xi32> to vector<8x1xf32>
    %66 = vector.broadcast %65 : vector<8x1xf32> to vector<8x32xf32>
    %67 = arith.mulf %66, %61 : vector<8x32xf32>
    %cst_55 = arith.constant 1.000000e+00 : f32
    %68 = vector.broadcast %cst_55 : f32 to vector<8x1xf32>
    %69 = arith.subf %68, %65 : vector<8x1xf32>
    %70 = vector.broadcast %69 : vector<8x1xf32> to vector<8x32xf32>
    %71 = arith.mulf %70, %37 : vector<8x32xf32>
    %72 = arith.addf %67, %71 : vector<8x32xf32>
    %c0_56 = arith.constant 0 : index
    %c0_57 = arith.constant 0 : index
    %73 = vector.load %arg20[%c0_56, %c0_57] : memref<8x32xf32, #tpu.memory_space<vmem>>, vector<8x32xf32>
    tpu.vector_store %arg20[%c0_56, %c0_57], %72 {strides = array<i32>} : memref<8x32xf32, #tpu.memory_space<vmem>>, vector<8x32xf32>,
    %c1_i32 = arith.constant 1 : i32
    %c8_i32_58 = arith.constant 8 : i32
    %74 = arith.muli %c1_i32, %c8_i32_58 : i32
    %75 = tpu.assume_multiple %74, 8 : i32
    %c0_59 = arith.constant 0 : index
    %c0_60 = arith.constant 0 : index
    %76 = vector.load %arg20[%c0_59, %c0_60] : memref<8x32xf32, #tpu.memory_space<vmem>>, vector<8x32xf32>
    %cst_61 = arith.constant dense<0.000000e+00> : vector<8x64xf32>
    %77 = tpu.matmul %76, %27, %cst_61 {dimension_numbers = #tpu.dot_dimension_numbers<[1], [0], [0], [1], [0, 0, 1, 1], [], []>} : vector<8x32xf32>, vector<32x64xf32>, vector<8x64xf32> -> vector<8x64xf32>
    %cst_62 = arith.constant dense<0.000000e+00> : vector<8x32xf32>
    %78 = tpu.matmul %76, %28, %cst_62 {dimension_numbers = #tpu.dot_dimension_numbers<[1], [0], [0], [1], [0, 0, 1, 1], [], []>} : vector<8x32xf32>, vector<32x32xf32>, vector<8x32xf32> -> vector<8x32xf32>
    %79 = vector.broadcast %29 : vector<1x32xf32> to vector<8x32xf32>
    %80 = arith.addf %78, %79 : vector<8x32xf32>
    %81 = arith.index_cast %75 : i32 to index
    %c0_63 = arith.constant 0 : index
    %82 = vector.load %arg21[%81, %c0_63] : memref<64x64xf32, #tpu.memory_space<vmem>>, vector<8x64xf32>
    %83 = arith.addf %82, %77 : vector<8x64xf32>
    %84 = arith.negf %83 : vector<8x64xf32>
    %85 = math.exp %84 : vector<8x64xf32>
    %cst_64 = arith.constant 1.000000e+00 : f32
    %86 = vector.broadcast %cst_64 : f32 to vector<8x64xf32>
    %87 = arith.addf %86, %85 : vector<8x64xf32>
    %88 = arith.divf %86, %87 : vector<8x64xf32>
    %89 = vector.extract_strided_slice %88 {offsets = [0, 0], sizes = [8, 32], strides = [1, 1]} : vector<8x64xf32> to vector<8x32xf32>
    %90 = vector.extract_strided_slice %88 {offsets = [0, 32], sizes = [8, 32], strides = [1, 1]} : vector<8x64xf32> to vector<8x32xf32>
    %91 = arith.index_cast %75 : i32 to index
    %c0_65 = arith.constant 0 : index
    %92 = vector.load %arg22[%91, %c0_65] : memref<64x32xf32, #tpu.memory_space<vmem>>, vector<8x32xf32>
    %93 = arith.mulf %89, %80 : vector<8x32xf32>
    %94 = arith.addf %92, %93 : vector<8x32xf32>
    %95 = math.tanh %94 : vector<8x32xf32>
    %cst_66 = arith.constant 1.000000e+00 : f32
    %96 = vector.broadcast %cst_66 : f32 to vector<8x32xf32>
    %97 = arith.subf %96, %90 : vector<8x32xf32>
    %98 = arith.mulf %97, %95 : vector<8x32xf32>
    %99 = arith.mulf %90, %76 : vector<8x32xf32>
    %100 = arith.addf %98, %99 : vector<8x32xf32>
    %101 = vector.broadcast %c1_i32 : i32 to vector<8x1xi32>
    %102 = arith.cmpi sgt, %26, %101 : vector<8x1xi32>
    %103 = arith.extui %102 : vector<8x1xi1> to vector<8x1xi32>
    %104 = arith.sitofp %103 : vector<8x1xi32> to vector<8x1xf32>
    %105 = vector.broadcast %104 : vector<8x1xf32> to vector<8x32xf32>
    %106 = arith.mulf %105, %100 : vector<8x32xf32>
    %cst_67 = arith.constant 1.000000e+00 : f32
    %107 = vector.broadcast %cst_67 : f32 to vector<8x1xf32>
    %108 = arith.subf %107, %104 : vector<8x1xf32>
    %109 = vector.broadcast %108 : vector<8x1xf32> to vector<8x32xf32>
    %110 = arith.mulf %109, %76 : vector<8x32xf32>
    %111 = arith.addf %106, %110 : vector<8x32xf32>
    %c0_68 = arith.constant 0 : index
    %c0_69 = arith.constant 0 : index
    %112 = vector.load %arg20[%c0_68, %c0_69] : memref<8x32xf32, #tpu.memory_space<vmem>>, vector<8x32xf32>
    tpu.vector_store %arg20[%c0_68, %c0_69], %111 {strides = array<i32>} : memref<8x32xf32, #tpu.memory_space<vmem>>, vector<8x32xf32>,
    %c2_i32 = arith.constant 2 : i32
    %c8_i32_70 = arith.constant 8 : i32
    %113 = arith.muli %c2_i32, %c8_i32_70 : i32
    %114 = tpu.assume_multiple %113, 8 : i32
    %c0_71 = arith.constant 0 : index
    %c0_72 = arith.constant 0 : index
    %115 = vector.load %arg20[%c0_71, %c0_72] : memref<8x32xf32, #tpu.memory_space<vmem>>, vector<8x32xf32>
    %cst_73 = arith.constant dense<0.000000e+00> : vector<8x64xf32>
    %116 = tpu.matmul %115, %27, %cst_73 {dimension_numbers = #tpu.dot_dimension_numbers<[1], [0], [0], [1], [0, 0, 1, 1], [], []>} : vector<8x32xf32>, vector<32x64xf32>, vector<8x64xf32> -> vector<8x64xf32>
    %cst_74 = arith.constant dense<0.000000e+00> : vector<8x32xf32>
    %117 = tpu.matmul %115, %28, %cst_74 {dimension_numbers = #tpu.dot_dimension_numbers<[1], [0], [0], [1], [0, 0, 1, 1], [], []>} : vector<8x32xf32>, vector<32x32xf32>, vector<8x32xf32> -> vector<8x32xf32>
    %118 = vector.broadcast %29 : vector<1x32xf32> to vector<8x32xf32>
    %119 = arith.addf %117, %118 : vector<8x32xf32>
    %120 = arith.index_cast %114 : i32 to index
    %c0_75 = arith.constant 0 : index
    %121 = vector.load %arg21[%120, %c0_75] : memref<64x64xf32, #tpu.memory_space<vmem>>, vector<8x64xf32>
    %122 = arith.addf %121, %116 : vector<8x64xf32>
    %123 = arith.negf %122 : vector<8x64xf32>
    %124 = math.exp %123 : vector<8x64xf32>
    %cst_76 = arith.constant 1.000000e+00 : f32
    %125 = vector.broadcast %cst_76 : f32 to vector<8x64xf32>
    %126 = arith.addf %125, %124 : vector<8x64xf32>
    %127 = arith.divf %125, %126 : vector<8x64xf32>
    %128 = vector.extract_strided_slice %127 {offsets = [0, 0], sizes = [8, 32], strides = [1, 1]} : vector<8x64xf32> to vector<8x32xf32>
    %129 = vector.extract_strided_slice %127 {offsets = [0, 32], sizes = [8, 32], strides = [1, 1]} : vector<8x64xf32> to vector<8x32xf32>
    %130 = arith.index_cast %114 : i32 to index
    %c0_77 = arith.constant 0 : index
    %131 = vector.load %arg22[%130, %c0_77] : memref<64x32xf32, #tpu.memory_space<vmem>>, vector<8x32xf32>
    %132 = arith.mulf %128, %119 : vector<8x32xf32>
    %133 = arith.addf %131, %132 : vector<8x32xf32>
    %134 = math.tanh %133 : vector<8x32xf32>
    %cst_78 = arith.constant 1.000000e+00 : f32
    %135 = vector.broadcast %cst_78 : f32 to vector<8x32xf32>
    %136 = arith.subf %135, %129 : vector<8x32xf32>
    %137 = arith.mulf %136, %134 : vector<8x32xf32>
    %138 = arith.mulf %129, %115 : vector<8x32xf32>
    %139 = arith.addf %137, %138 : vector<8x32xf32>
    %140 = vector.broadcast %c2_i32 : i32 to vector<8x1xi32>
    %141 = arith.cmpi sgt, %26, %140 : vector<8x1xi32>
    %142 = arith.extui %141 : vector<8x1xi1> to vector<8x1xi32>
    %143 = arith.sitofp %142 : vector<8x1xi32> to vector<8x1xf32>
    %144 = vector.broadcast %143 : vector<8x1xf32> to vector<8x32xf32>
    %145 = arith.mulf %144, %139 : vector<8x32xf32>
    %cst_79 = arith.constant 1.000000e+00 : f32
    %146 = vector.broadcast %cst_79 : f32 to vector<8x1xf32>
    %147 = arith.subf %146, %143 : vector<8x1xf32>
    %148 = vector.broadcast %147 : vector<8x1xf32> to vector<8x32xf32>
    %149 = arith.mulf %148, %115 : vector<8x32xf32>
    %150 = arith.addf %145, %149 : vector<8x32xf32>
    %c0_80 = arith.constant 0 : index
    %c0_81 = arith.constant 0 : index
    %151 = vector.load %arg20[%c0_80, %c0_81] : memref<8x32xf32, #tpu.memory_space<vmem>>, vector<8x32xf32>
    tpu.vector_store %arg20[%c0_80, %c0_81], %150 {strides = array<i32>} : memref<8x32xf32, #tpu.memory_space<vmem>>, vector<8x32xf32>,
    %c3_i32 = arith.constant 3 : i32
    %c8_i32_82 = arith.constant 8 : i32
    %152 = arith.muli %c3_i32, %c8_i32_82 : i32
    %153 = tpu.assume_multiple %152, 8 : i32
    %c0_83 = arith.constant 0 : index
    %c0_84 = arith.constant 0 : index
    %154 = vector.load %arg20[%c0_83, %c0_84] : memref<8x32xf32, #tpu.memory_space<vmem>>, vector<8x32xf32>
    %cst_85 = arith.constant dense<0.000000e+00> : vector<8x64xf32>
    %155 = tpu.matmul %154, %27, %cst_85 {dimension_numbers = #tpu.dot_dimension_numbers<[1], [0], [0], [1], [0, 0, 1, 1], [], []>} : vector<8x32xf32>, vector<32x64xf32>, vector<8x64xf32> -> vector<8x64xf32>
    %cst_86 = arith.constant dense<0.000000e+00> : vector<8x32xf32>
    %156 = tpu.matmul %154, %28, %cst_86 {dimension_numbers = #tpu.dot_dimension_numbers<[1], [0], [0], [1], [0, 0, 1, 1], [], []>} : vector<8x32xf32>, vector<32x32xf32>, vector<8x32xf32> -> vector<8x32xf32>
    %157 = vector.broadcast %29 : vector<1x32xf32> to vector<8x32xf32>
    %158 = arith.addf %156, %157 : vector<8x32xf32>
    %159 = arith.index_cast %153 : i32 to index
    %c0_87 = arith.constant 0 : index
    %160 = vector.load %arg21[%159, %c0_87] : memref<64x64xf32, #tpu.memory_space<vmem>>, vector<8x64xf32>
    %161 = arith.addf %160, %155 : vector<8x64xf32>
    %162 = arith.negf %161 : vector<8x64xf32>
    %163 = math.exp %162 : vector<8x64xf32>
    %cst_88 = arith.constant 1.000000e+00 : f32
    %164 = vector.broadcast %cst_88 : f32 to vector<8x64xf32>
    %165 = arith.addf %164, %163 : vector<8x64xf32>
    %166 = arith.divf %164, %165 : vector<8x64xf32>
    %167 = vector.extract_strided_slice %166 {offsets = [0, 0], sizes = [8, 32], strides = [1, 1]} : vector<8x64xf32> to vector<8x32xf32>
    %168 = vector.extract_strided_slice %166 {offsets = [0, 32], sizes = [8, 32], strides = [1, 1]} : vector<8x64xf32> to vector<8x32xf32>
    %169 = arith.index_cast %153 : i32 to index
    %c0_89 = arith.constant 0 : index
    %170 = vector.load %arg22[%169, %c0_89] : memref<64x32xf32, #tpu.memory_space<vmem>>, vector<8x32xf32>
    %171 = arith.mulf %167, %158 : vector<8x32xf32>
    %172 = arith.addf %170, %171 : vector<8x32xf32>
    %173 = math.tanh %172 : vector<8x32xf32>
    %cst_90 = arith.constant 1.000000e+00 : f32
    %174 = vector.broadcast %cst_90 : f32 to vector<8x32xf32>
    %175 = arith.subf %174, %168 : vector<8x32xf32>
    %176 = arith.mulf %175, %173 : vector<8x32xf32>
    %177 = arith.mulf %168, %154 : vector<8x32xf32>
    %178 = arith.addf %176, %177 : vector<8x32xf32>
    %179 = vector.broadcast %c3_i32 : i32 to vector<8x1xi32>
    %180 = arith.cmpi sgt, %26, %179 : vector<8x1xi32>
    %181 = arith.extui %180 : vector<8x1xi1> to vector<8x1xi32>
    %182 = arith.sitofp %181 : vector<8x1xi32> to vector<8x1xf32>
    %183 = vector.broadcast %182 : vector<8x1xf32> to vector<8x32xf32>
    %184 = arith.mulf %183, %178 : vector<8x32xf32>
    %cst_91 = arith.constant 1.000000e+00 : f32
    %185 = vector.broadcast %cst_91 : f32 to vector<8x1xf32>
    %186 = arith.subf %185, %182 : vector<8x1xf32>
    %187 = vector.broadcast %186 : vector<8x1xf32> to vector<8x32xf32>
    %188 = arith.mulf %187, %154 : vector<8x32xf32>
    %189 = arith.addf %184, %188 : vector<8x32xf32>
    %c0_92 = arith.constant 0 : index
    %c0_93 = arith.constant 0 : index
    %190 = vector.load %arg20[%c0_92, %c0_93] : memref<8x32xf32, #tpu.memory_space<vmem>>, vector<8x32xf32>
    tpu.vector_store %arg20[%c0_92, %c0_93], %189 {strides = array<i32>} : memref<8x32xf32, #tpu.memory_space<vmem>>, vector<8x32xf32>,
    %c4_i32 = arith.constant 4 : i32
    %c8_i32_94 = arith.constant 8 : i32
    %191 = arith.muli %c4_i32, %c8_i32_94 : i32
    %192 = tpu.assume_multiple %191, 8 : i32
    %c0_95 = arith.constant 0 : index
    %c0_96 = arith.constant 0 : index
    %193 = vector.load %arg20[%c0_95, %c0_96] : memref<8x32xf32, #tpu.memory_space<vmem>>, vector<8x32xf32>
    %cst_97 = arith.constant dense<0.000000e+00> : vector<8x64xf32>
    %194 = tpu.matmul %193, %27, %cst_97 {dimension_numbers = #tpu.dot_dimension_numbers<[1], [0], [0], [1], [0, 0, 1, 1], [], []>} : vector<8x32xf32>, vector<32x64xf32>, vector<8x64xf32> -> vector<8x64xf32>
    %cst_98 = arith.constant dense<0.000000e+00> : vector<8x32xf32>
    %195 = tpu.matmul %193, %28, %cst_98 {dimension_numbers = #tpu.dot_dimension_numbers<[1], [0], [0], [1], [0, 0, 1, 1], [], []>} : vector<8x32xf32>, vector<32x32xf32>, vector<8x32xf32> -> vector<8x32xf32>
    %196 = vector.broadcast %29 : vector<1x32xf32> to vector<8x32xf32>
    %197 = arith.addf %195, %196 : vector<8x32xf32>
    %198 = arith.index_cast %192 : i32 to index
    %c0_99 = arith.constant 0 : index
    %199 = vector.load %arg21[%198, %c0_99] : memref<64x64xf32, #tpu.memory_space<vmem>>, vector<8x64xf32>
    %200 = arith.addf %199, %194 : vector<8x64xf32>
    %201 = arith.negf %200 : vector<8x64xf32>
    %202 = math.exp %201 : vector<8x64xf32>
    %cst_100 = arith.constant 1.000000e+00 : f32
    %203 = vector.broadcast %cst_100 : f32 to vector<8x64xf32>
    %204 = arith.addf %203, %202 : vector<8x64xf32>
    %205 = arith.divf %203, %204 : vector<8x64xf32>
    %206 = vector.extract_strided_slice %205 {offsets = [0, 0], sizes = [8, 32], strides = [1, 1]} : vector<8x64xf32> to vector<8x32xf32>
    %207 = vector.extract_strided_slice %205 {offsets = [0, 32], sizes = [8, 32], strides = [1, 1]} : vector<8x64xf32> to vector<8x32xf32>
    %208 = arith.index_cast %192 : i32 to index
    %c0_101 = arith.constant 0 : index
    %209 = vector.load %arg22[%208, %c0_101] : memref<64x32xf32, #tpu.memory_space<vmem>>, vector<8x32xf32>
    %210 = arith.mulf %206, %197 : vector<8x32xf32>
    %211 = arith.addf %209, %210 : vector<8x32xf32>
    %212 = math.tanh %211 : vector<8x32xf32>
    %cst_102 = arith.constant 1.000000e+00 : f32
    %213 = vector.broadcast %cst_102 : f32 to vector<8x32xf32>
    %214 = arith.subf %213, %207 : vector<8x32xf32>
    %215 = arith.mulf %214, %212 : vector<8x32xf32>
    %216 = arith.mulf %207, %193 : vector<8x32xf32>
    %217 = arith.addf %215, %216 : vector<8x32xf32>
    %218 = vector.broadcast %c4_i32 : i32 to vector<8x1xi32>
    %219 = arith.cmpi sgt, %26, %218 : vector<8x1xi32>
    %220 = arith.extui %219 : vector<8x1xi1> to vector<8x1xi32>
    %221 = arith.sitofp %220 : vector<8x1xi32> to vector<8x1xf32>
    %222 = vector.broadcast %221 : vector<8x1xf32> to vector<8x32xf32>
    %223 = arith.mulf %222, %217 : vector<8x32xf32>
    %cst_103 = arith.constant 1.000000e+00 : f32
    %224 = vector.broadcast %cst_103 : f32 to vector<8x1xf32>
    %225 = arith.subf %224, %221 : vector<8x1xf32>
    %226 = vector.broadcast %225 : vector<8x1xf32> to vector<8x32xf32>
    %227 = arith.mulf %226, %193 : vector<8x32xf32>
    %228 = arith.addf %223, %227 : vector<8x32xf32>
    %c0_104 = arith.constant 0 : index
    %c0_105 = arith.constant 0 : index
    %229 = vector.load %arg20[%c0_104, %c0_105] : memref<8x32xf32, #tpu.memory_space<vmem>>, vector<8x32xf32>
    tpu.vector_store %arg20[%c0_104, %c0_105], %228 {strides = array<i32>} : memref<8x32xf32, #tpu.memory_space<vmem>>, vector<8x32xf32>,
    %c5_i32 = arith.constant 5 : i32
    %c8_i32_106 = arith.constant 8 : i32
    %230 = arith.muli %c5_i32, %c8_i32_106 : i32
    %231 = tpu.assume_multiple %230, 8 : i32
    %c0_107 = arith.constant 0 : index
    %c0_108 = arith.constant 0 : index
    %232 = vector.load %arg20[%c0_107, %c0_108] : memref<8x32xf32, #tpu.memory_space<vmem>>, vector<8x32xf32>
    %cst_109 = arith.constant dense<0.000000e+00> : vector<8x64xf32>
    %233 = tpu.matmul %232, %27, %cst_109 {dimension_numbers = #tpu.dot_dimension_numbers<[1], [0], [0], [1], [0, 0, 1, 1], [], []>} : vector<8x32xf32>, vector<32x64xf32>, vector<8x64xf32> -> vector<8x64xf32>
    %cst_110 = arith.constant dense<0.000000e+00> : vector<8x32xf32>
    %234 = tpu.matmul %232, %28, %cst_110 {dimension_numbers = #tpu.dot_dimension_numbers<[1], [0], [0], [1], [0, 0, 1, 1], [], []>} : vector<8x32xf32>, vector<32x32xf32>, vector<8x32xf32> -> vector<8x32xf32>
    %235 = vector.broadcast %29 : vector<1x32xf32> to vector<8x32xf32>
    %236 = arith.addf %234, %235 : vector<8x32xf32>
    %237 = arith.index_cast %231 : i32 to index
    %c0_111 = arith.constant 0 : index
    %238 = vector.load %arg21[%237, %c0_111] : memref<64x64xf32, #tpu.memory_space<vmem>>, vector<8x64xf32>
    %239 = arith.addf %238, %233 : vector<8x64xf32>
    %240 = arith.negf %239 : vector<8x64xf32>
    %241 = math.exp %240 : vector<8x64xf32>
    %cst_112 = arith.constant 1.000000e+00 : f32
    %242 = vector.broadcast %cst_112 : f32 to vector<8x64xf32>
    %243 = arith.addf %242, %241 : vector<8x64xf32>
    %244 = arith.divf %242, %243 : vector<8x64xf32>
    %245 = vector.extract_strided_slice %244 {offsets = [0, 0], sizes = [8, 32], strides = [1, 1]} : vector<8x64xf32> to vector<8x32xf32>
    %246 = vector.extract_strided_slice %244 {offsets = [0, 32], sizes = [8, 32], strides = [1, 1]} : vector<8x64xf32> to vector<8x32xf32>
    %247 = arith.index_cast %231 : i32 to index
    %c0_113 = arith.constant 0 : index
    %248 = vector.load %arg22[%247, %c0_113] : memref<64x32xf32, #tpu.memory_space<vmem>>, vector<8x32xf32>
    %249 = arith.mulf %245, %236 : vector<8x32xf32>
    %250 = arith.addf %248, %249 : vector<8x32xf32>
    %251 = math.tanh %250 : vector<8x32xf32>
    %cst_114 = arith.constant 1.000000e+00 : f32
    %252 = vector.broadcast %cst_114 : f32 to vector<8x32xf32>
    %253 = arith.subf %252, %246 : vector<8x32xf32>
    %254 = arith.mulf %253, %251 : vector<8x32xf32>
    %255 = arith.mulf %246, %232 : vector<8x32xf32>
    %256 = arith.addf %254, %255 : vector<8x32xf32>
    %257 = vector.broadcast %c5_i32 : i32 to vector<8x1xi32>
    %258 = arith.cmpi sgt, %26, %257 : vector<8x1xi32>
    %259 = arith.extui %258 : vector<8x1xi1> to vector<8x1xi32>
    %260 = arith.sitofp %259 : vector<8x1xi32> to vector<8x1xf32>
    %261 = vector.broadcast %260 : vector<8x1xf32> to vector<8x32xf32>
    %262 = arith.mulf %261, %256 : vector<8x32xf32>
    %cst_115 = arith.constant 1.000000e+00 : f32
    %263 = vector.broadcast %cst_115 : f32 to vector<8x1xf32>
    %264 = arith.subf %263, %260 : vector<8x1xf32>
    %265 = vector.broadcast %264 : vector<8x1xf32> to vector<8x32xf32>
    %266 = arith.mulf %265, %232 : vector<8x32xf32>
    %267 = arith.addf %262, %266 : vector<8x32xf32>
    %c0_116 = arith.constant 0 : index
    %c0_117 = arith.constant 0 : index
    %268 = vector.load %arg20[%c0_116, %c0_117] : memref<8x32xf32, #tpu.memory_space<vmem>>, vector<8x32xf32>
    tpu.vector_store %arg20[%c0_116, %c0_117], %267 {strides = array<i32>} : memref<8x32xf32, #tpu.memory_space<vmem>>, vector<8x32xf32>,
    %c6_i32 = arith.constant 6 : i32
    %c8_i32_118 = arith.constant 8 : i32
    %269 = arith.muli %c6_i32, %c8_i32_118 : i32
    %270 = tpu.assume_multiple %269, 8 : i32
    %c0_119 = arith.constant 0 : index
    %c0_120 = arith.constant 0 : index
    %271 = vector.load %arg20[%c0_119, %c0_120] : memref<8x32xf32, #tpu.memory_space<vmem>>, vector<8x32xf32>
    %cst_121 = arith.constant dense<0.000000e+00> : vector<8x64xf32>
    %272 = tpu.matmul %271, %27, %cst_121 {dimension_numbers = #tpu.dot_dimension_numbers<[1], [0], [0], [1], [0, 0, 1, 1], [], []>} : vector<8x32xf32>, vector<32x64xf32>, vector<8x64xf32> -> vector<8x64xf32>
    %cst_122 = arith.constant dense<0.000000e+00> : vector<8x32xf32>
    %273 = tpu.matmul %271, %28, %cst_122 {dimension_numbers = #tpu.dot_dimension_numbers<[1], [0], [0], [1], [0, 0, 1, 1], [], []>} : vector<8x32xf32>, vector<32x32xf32>, vector<8x32xf32> -> vector<8x32xf32>
    %274 = vector.broadcast %29 : vector<1x32xf32> to vector<8x32xf32>
    %275 = arith.addf %273, %274 : vector<8x32xf32>
    %276 = arith.index_cast %270 : i32 to index
    %c0_123 = arith.constant 0 : index
    %277 = vector.load %arg21[%276, %c0_123] : memref<64x64xf32, #tpu.memory_space<vmem>>, vector<8x64xf32>
    %278 = arith.addf %277, %272 : vector<8x64xf32>
    %279 = arith.negf %278 : vector<8x64xf32>
    %280 = math.exp %279 : vector<8x64xf32>
    %cst_124 = arith.constant 1.000000e+00 : f32
    %281 = vector.broadcast %cst_124 : f32 to vector<8x64xf32>
    %282 = arith.addf %281, %280 : vector<8x64xf32>
    %283 = arith.divf %281, %282 : vector<8x64xf32>
    %284 = vector.extract_strided_slice %283 {offsets = [0, 0], sizes = [8, 32], strides = [1, 1]} : vector<8x64xf32> to vector<8x32xf32>
    %285 = vector.extract_strided_slice %283 {offsets = [0, 32], sizes = [8, 32], strides = [1, 1]} : vector<8x64xf32> to vector<8x32xf32>
    %286 = arith.index_cast %270 : i32 to index
    %c0_125 = arith.constant 0 : index
    %287 = vector.load %arg22[%286, %c0_125] : memref<64x32xf32, #tpu.memory_space<vmem>>, vector<8x32xf32>
    %288 = arith.mulf %284, %275 : vector<8x32xf32>
    %289 = arith.addf %287, %288 : vector<8x32xf32>
    %290 = math.tanh %289 : vector<8x32xf32>
    %cst_126 = arith.constant 1.000000e+00 : f32
    %291 = vector.broadcast %cst_126 : f32 to vector<8x32xf32>
    %292 = arith.subf %291, %285 : vector<8x32xf32>
    %293 = arith.mulf %292, %290 : vector<8x32xf32>
    %294 = arith.mulf %285, %271 : vector<8x32xf32>
    %295 = arith.addf %293, %294 : vector<8x32xf32>
    %296 = vector.broadcast %c6_i32 : i32 to vector<8x1xi32>
    %297 = arith.cmpi sgt, %26, %296 : vector<8x1xi32>
    %298 = arith.extui %297 : vector<8x1xi1> to vector<8x1xi32>
    %299 = arith.sitofp %298 : vector<8x1xi32> to vector<8x1xf32>
    %300 = vector.broadcast %299 : vector<8x1xf32> to vector<8x32xf32>
    %301 = arith.mulf %300, %295 : vector<8x32xf32>
    %cst_127 = arith.constant 1.000000e+00 : f32
    %302 = vector.broadcast %cst_127 : f32 to vector<8x1xf32>
    %303 = arith.subf %302, %299 : vector<8x1xf32>
    %304 = vector.broadcast %303 : vector<8x1xf32> to vector<8x32xf32>
    %305 = arith.mulf %304, %271 : vector<8x32xf32>
    %306 = arith.addf %301, %305 : vector<8x32xf32>
    %c0_128 = arith.constant 0 : index
    %c0_129 = arith.constant 0 : index
    %307 = vector.load %arg20[%c0_128, %c0_129] : memref<8x32xf32, #tpu.memory_space<vmem>>, vector<8x32xf32>
    tpu.vector_store %arg20[%c0_128, %c0_129], %306 {strides = array<i32>} : memref<8x32xf32, #tpu.memory_space<vmem>>, vector<8x32xf32>,
    %c7_i32 = arith.constant 7 : i32
    %c8_i32_130 = arith.constant 8 : i32
    %308 = arith.muli %c7_i32, %c8_i32_130 : i32
    %309 = tpu.assume_multiple %308, 8 : i32
    %c0_131 = arith.constant 0 : index
    %c0_132 = arith.constant 0 : index
    %310 = vector.load %arg20[%c0_131, %c0_132] : memref<8x32xf32, #tpu.memory_space<vmem>>, vector<8x32xf32>
    %cst_133 = arith.constant dense<0.000000e+00> : vector<8x64xf32>
    %311 = tpu.matmul %310, %27, %cst_133 {dimension_numbers = #tpu.dot_dimension_numbers<[1], [0], [0], [1], [0, 0, 1, 1], [], []>} : vector<8x32xf32>, vector<32x64xf32>, vector<8x64xf32> -> vector<8x64xf32>
    %cst_134 = arith.constant dense<0.000000e+00> : vector<8x32xf32>
    %312 = tpu.matmul %310, %28, %cst_134 {dimension_numbers = #tpu.dot_dimension_numbers<[1], [0], [0], [1], [0, 0, 1, 1], [], []>} : vector<8x32xf32>, vector<32x32xf32>, vector<8x32xf32> -> vector<8x32xf32>
    %313 = vector.broadcast %29 : vector<1x32xf32> to vector<8x32xf32>
    %314 = arith.addf %312, %313 : vector<8x32xf32>
    %315 = arith.index_cast %309 : i32 to index
    %c0_135 = arith.constant 0 : index
    %316 = vector.load %arg21[%315, %c0_135] : memref<64x64xf32, #tpu.memory_space<vmem>>, vector<8x64xf32>
    %317 = arith.addf %316, %311 : vector<8x64xf32>
    %318 = arith.negf %317 : vector<8x64xf32>
    %319 = math.exp %318 : vector<8x64xf32>
    %cst_136 = arith.constant 1.000000e+00 : f32
    %320 = vector.broadcast %cst_136 : f32 to vector<8x64xf32>
    %321 = arith.addf %320, %319 : vector<8x64xf32>
    %322 = arith.divf %320, %321 : vector<8x64xf32>
    %323 = vector.extract_strided_slice %322 {offsets = [0, 0], sizes = [8, 32], strides = [1, 1]} : vector<8x64xf32> to vector<8x32xf32>
    %324 = vector.extract_strided_slice %322 {offsets = [0, 32], sizes = [8, 32], strides = [1, 1]} : vector<8x64xf32> to vector<8x32xf32>
    %325 = arith.index_cast %309 : i32 to index
    %c0_137 = arith.constant 0 : index
    %326 = vector.load %arg22[%325, %c0_137] : memref<64x32xf32, #tpu.memory_space<vmem>>, vector<8x32xf32>
    %327 = arith.mulf %323, %314 : vector<8x32xf32>
    %328 = arith.addf %326, %327 : vector<8x32xf32>
    %329 = math.tanh %328 : vector<8x32xf32>
    %cst_138 = arith.constant 1.000000e+00 : f32
    %330 = vector.broadcast %cst_138 : f32 to vector<8x32xf32>
    %331 = arith.subf %330, %324 : vector<8x32xf32>
    %332 = arith.mulf %331, %329 : vector<8x32xf32>
    %333 = arith.mulf %324, %310 : vector<8x32xf32>
    %334 = arith.addf %332, %333 : vector<8x32xf32>
    %335 = vector.broadcast %c7_i32 : i32 to vector<8x1xi32>
    %336 = arith.cmpi sgt, %26, %335 : vector<8x1xi32>
    %337 = arith.extui %336 : vector<8x1xi1> to vector<8x1xi32>
    %338 = arith.sitofp %337 : vector<8x1xi32> to vector<8x1xf32>
    %339 = vector.broadcast %338 : vector<8x1xf32> to vector<8x32xf32>
    %340 = arith.mulf %339, %334 : vector<8x32xf32>
    %cst_139 = arith.constant 1.000000e+00 : f32
    %341 = vector.broadcast %cst_139 : f32 to vector<8x1xf32>
    %342 = arith.subf %341, %338 : vector<8x1xf32>
    %343 = vector.broadcast %342 : vector<8x1xf32> to vector<8x32xf32>
    %344 = arith.mulf %343, %310 : vector<8x32xf32>
    %345 = arith.addf %340, %344 : vector<8x32xf32>
    %c0_140 = arith.constant 0 : index
    %c0_141 = arith.constant 0 : index
    %346 = vector.load %arg20[%c0_140, %c0_141] : memref<8x32xf32, #tpu.memory_space<vmem>>, vector<8x32xf32>
    tpu.vector_store %arg20[%c0_140, %c0_141], %345 {strides = array<i32>} : memref<8x32xf32, #tpu.memory_space<vmem>>, vector<8x32xf32>,
    %c8_i32_142 = arith.constant 8 : i32
    %c0_i32_143 = arith.constant 0 : i32
    %c8_i32_144 = arith.constant 8 : i32
    %347 = arith.muli %c0_i32_143, %c8_i32_144 : i32
    %348 = tpu.assume_multiple %347, 8 : i32
    %c0_145 = arith.constant 0 : index
    %c0_146 = arith.constant 0 : index
    %349 = vector.load %arg20[%c0_145, %c0_146] : memref<8x32xf32, #tpu.memory_space<vmem>>, vector<8x32xf32>
    %cst_147 = arith.constant dense<0.000000e+00> : vector<8x64xf32>
    %350 = tpu.matmul %349, %30, %cst_147 {dimension_numbers = #tpu.dot_dimension_numbers<[1], [0], [0], [1], [0, 0, 1, 1], [], []>} : vector<8x32xf32>, vector<32x64xf32>, vector<8x64xf32> -> vector<8x64xf32>
    %cst_148 = arith.constant dense<0.000000e+00> : vector<8x32xf32>
    %351 = tpu.matmul %349, %31, %cst_148 {dimension_numbers = #tpu.dot_dimension_numbers<[1], [0], [0], [1], [0, 0, 1, 1], [], []>} : vector<8x32xf32>, vector<32x32xf32>, vector<8x32xf32> -> vector<8x32xf32>
    %352 = vector.broadcast %32 : vector<1x32xf32> to vector<8x32xf32>
    %353 = arith.addf %351, %352 : vector<8x32xf32>
    %354 = arith.index_cast %348 : i32 to index
    %c0_149 = arith.constant 0 : index
    %355 = vector.load %arg23[%354, %c0_149] : memref<48x64xf32, #tpu.memory_space<vmem>>, vector<8x64xf32>
    %356 = arith.addf %355, %350 : vector<8x64xf32>
    %357 = arith.negf %356 : vector<8x64xf32>
    %358 = math.exp %357 : vector<8x64xf32>
    %cst_150 = arith.constant 1.000000e+00 : f32
    %359 = vector.broadcast %cst_150 : f32 to vector<8x64xf32>
    %360 = arith.addf %359, %358 : vector<8x64xf32>
    %361 = arith.divf %359, %360 : vector<8x64xf32>
    %362 = vector.extract_strided_slice %361 {offsets = [0, 0], sizes = [8, 32], strides = [1, 1]} : vector<8x64xf32> to vector<8x32xf32>
    %363 = vector.extract_strided_slice %361 {offsets = [0, 32], sizes = [8, 32], strides = [1, 1]} : vector<8x64xf32> to vector<8x32xf32>
    %364 = arith.index_cast %348 : i32 to index
    %c0_151 = arith.constant 0 : index
    %365 = vector.load %arg24[%364, %c0_151] : memref<48x32xf32, #tpu.memory_space<vmem>>, vector<8x32xf32>
    %366 = arith.mulf %362, %353 : vector<8x32xf32>
    %367 = arith.addf %365, %366 : vector<8x32xf32>
    %368 = math.tanh %367 : vector<8x32xf32>
    %cst_152 = arith.constant 1.000000e+00 : f32
    %369 = vector.broadcast %cst_152 : f32 to vector<8x32xf32>
    %370 = arith.subf %369, %363 : vector<8x32xf32>
    %371 = arith.mulf %370, %368 : vector<8x32xf32>
    %372 = arith.mulf %363, %349 : vector<8x32xf32>
    %373 = arith.addf %371, %372 : vector<8x32xf32>
    %c0_153 = arith.constant 0 : index
    %c0_154 = arith.constant 0 : index
    %374 = vector.load %arg20[%c0_153, %c0_154] : memref<8x32xf32, #tpu.memory_space<vmem>>, vector<8x32xf32>
    tpu.vector_store %arg20[%c0_153, %c0_154], %373 {strides = array<i32>} : memref<8x32xf32, #tpu.memory_space<vmem>>, vector<8x32xf32>,
    %375 = arith.index_cast %348 : i32 to index
    %c0_155 = arith.constant 0 : index
    %376 = vector.load %arg25[%375, %c0_155] : memref<48x32xf32, #tpu.memory_space<vmem>>, vector<8x32xf32>
    tpu.vector_store %arg25[%375, %c0_155], %373 {strides = array<i32>} : memref<48x32xf32, #tpu.memory_space<vmem>>, vector<8x32xf32>,
    %c1_i32_156 = arith.constant 1 : i32
    %c8_i32_157 = arith.constant 8 : i32
    %377 = arith.muli %c1_i32_156, %c8_i32_157 : i32
    %378 = tpu.assume_multiple %377, 8 : i32
    %c0_158 = arith.constant 0 : index
    %c0_159 = arith.constant 0 : index
    %379 = vector.load %arg20[%c0_158, %c0_159] : memref<8x32xf32, #tpu.memory_space<vmem>>, vector<8x32xf32>
    %cst_160 = arith.constant dense<0.000000e+00> : vector<8x64xf32>
    %380 = tpu.matmul %379, %30, %cst_160 {dimension_numbers = #tpu.dot_dimension_numbers<[1], [0], [0], [1], [0, 0, 1, 1], [], []>} : vector<8x32xf32>, vector<32x64xf32>, vector<8x64xf32> -> vector<8x64xf32>
    %cst_161 = arith.constant dense<0.000000e+00> : vector<8x32xf32>
    %381 = tpu.matmul %379, %31, %cst_161 {dimension_numbers = #tpu.dot_dimension_numbers<[1], [0], [0], [1], [0, 0, 1, 1], [], []>} : vector<8x32xf32>, vector<32x32xf32>, vector<8x32xf32> -> vector<8x32xf32>
    %382 = vector.broadcast %32 : vector<1x32xf32> to vector<8x32xf32>
    %383 = arith.addf %381, %382 : vector<8x32xf32>
    %384 = arith.index_cast %378 : i32 to index
    %c0_162 = arith.constant 0 : index
    %385 = vector.load %arg23[%384, %c0_162] : memref<48x64xf32, #tpu.memory_space<vmem>>, vector<8x64xf32>
    %386 = arith.addf %385, %380 : vector<8x64xf32>
    %387 = arith.negf %386 : vector<8x64xf32>
    %388 = math.exp %387 : vector<8x64xf32>
    %cst_163 = arith.constant 1.000000e+00 : f32
    %389 = vector.broadcast %cst_163 : f32 to vector<8x64xf32>
    %390 = arith.addf %389, %388 : vector<8x64xf32>
    %391 = arith.divf %389, %390 : vector<8x64xf32>
    %392 = vector.extract_strided_slice %391 {offsets = [0, 0], sizes = [8, 32], strides = [1, 1]} : vector<8x64xf32> to vector<8x32xf32>
    %393 = vector.extract_strided_slice %391 {offsets = [0, 32], sizes = [8, 32], strides = [1, 1]} : vector<8x64xf32> to vector<8x32xf32>
    %394 = arith.index_cast %378 : i32 to index
    %c0_164 = arith.constant 0 : index
    %395 = vector.load %arg24[%394, %c0_164] : memref<48x32xf32, #tpu.memory_space<vmem>>, vector<8x32xf32>
    %396 = arith.mulf %392, %383 : vector<8x32xf32>
    %397 = arith.addf %395, %396 : vector<8x32xf32>
    %398 = math.tanh %397 : vector<8x32xf32>
    %cst_165 = arith.constant 1.000000e+00 : f32
    %399 = vector.broadcast %cst_165 : f32 to vector<8x32xf32>
    %400 = arith.subf %399, %393 : vector<8x32xf32>
    %401 = arith.mulf %400, %398 : vector<8x32xf32>
    %402 = arith.mulf %393, %379 : vector<8x32xf32>
    %403 = arith.addf %401, %402 : vector<8x32xf32>
    %c0_166 = arith.constant 0 : index
    %c0_167 = arith.constant 0 : index
    %404 = vector.load %arg20[%c0_166, %c0_167] : memref<8x32xf32, #tpu.memory_space<vmem>>, vector<8x32xf32>
    tpu.vector_store %arg20[%c0_166, %c0_167], %403 {strides = array<i32>} : memref<8x32xf32, #tpu.memory_space<vmem>>, vector<8x32xf32>,
    %405 = arith.index_cast %378 : i32 to index
    %c0_168 = arith.constant 0 : index
    %406 = vector.load %arg25[%405, %c0_168] : memref<48x32xf32, #tpu.memory_space<vmem>>, vector<8x32xf32>
    tpu.vector_store %arg25[%405, %c0_168], %403 {strides = array<i32>} : memref<48x32xf32, #tpu.memory_space<vmem>>, vector<8x32xf32>,
    %c2_i32_169 = arith.constant 2 : i32
    %c8_i32_170 = arith.constant 8 : i32
    %407 = arith.muli %c2_i32_169, %c8_i32_170 : i32
    %408 = tpu.assume_multiple %407, 8 : i32
    %c0_171 = arith.constant 0 : index
    %c0_172 = arith.constant 0 : index
    %409 = vector.load %arg20[%c0_171, %c0_172] : memref<8x32xf32, #tpu.memory_space<vmem>>, vector<8x32xf32>
    %cst_173 = arith.constant dense<0.000000e+00> : vector<8x64xf32>
    %410 = tpu.matmul %409, %30, %cst_173 {dimension_numbers = #tpu.dot_dimension_numbers<[1], [0], [0], [1], [0, 0, 1, 1], [], []>} : vector<8x32xf32>, vector<32x64xf32>, vector<8x64xf32> -> vector<8x64xf32>
    %cst_174 = arith.constant dense<0.000000e+00> : vector<8x32xf32>
    %411 = tpu.matmul %409, %31, %cst_174 {dimension_numbers = #tpu.dot_dimension_numbers<[1], [0], [0], [1], [0, 0, 1, 1], [], []>} : vector<8x32xf32>, vector<32x32xf32>, vector<8x32xf32> -> vector<8x32xf32>
    %412 = vector.broadcast %32 : vector<1x32xf32> to vector<8x32xf32>
    %413 = arith.addf %411, %412 : vector<8x32xf32>
    %414 = arith.index_cast %408 : i32 to index
    %c0_175 = arith.constant 0 : index
    %415 = vector.load %arg23[%414, %c0_175] : memref<48x64xf32, #tpu.memory_space<vmem>>, vector<8x64xf32>
    %416 = arith.addf %415, %410 : vector<8x64xf32>
    %417 = arith.negf %416 : vector<8x64xf32>
    %418 = math.exp %417 : vector<8x64xf32>
    %cst_176 = arith.constant 1.000000e+00 : f32
    %419 = vector.broadcast %cst_176 : f32 to vector<8x64xf32>
    %420 = arith.addf %419, %418 : vector<8x64xf32>
    %421 = arith.divf %419, %420 : vector<8x64xf32>
    %422 = vector.extract_strided_slice %421 {offsets = [0, 0], sizes = [8, 32], strides = [1, 1]} : vector<8x64xf32> to vector<8x32xf32>
    %423 = vector.extract_strided_slice %421 {offsets = [0, 32], sizes = [8, 32], strides = [1, 1]} : vector<8x64xf32> to vector<8x32xf32>
    %424 = arith.index_cast %408 : i32 to index
    %c0_177 = arith.constant 0 : index
    %425 = vector.load %arg24[%424, %c0_177] : memref<48x32xf32, #tpu.memory_space<vmem>>, vector<8x32xf32>
    %426 = arith.mulf %422, %413 : vector<8x32xf32>
    %427 = arith.addf %425, %426 : vector<8x32xf32>
    %428 = math.tanh %427 : vector<8x32xf32>
    %cst_178 = arith.constant 1.000000e+00 : f32
    %429 = vector.broadcast %cst_178 : f32 to vector<8x32xf32>
    %430 = arith.subf %429, %423 : vector<8x32xf32>
    %431 = arith.mulf %430, %428 : vector<8x32xf32>
    %432 = arith.mulf %423, %409 : vector<8x32xf32>
    %433 = arith.addf %431, %432 : vector<8x32xf32>
    %c0_179 = arith.constant 0 : index
    %c0_180 = arith.constant 0 : index
    %434 = vector.load %arg20[%c0_179, %c0_180] : memref<8x32xf32, #tpu.memory_space<vmem>>, vector<8x32xf32>
    tpu.vector_store %arg20[%c0_179, %c0_180], %433 {strides = array<i32>} : memref<8x32xf32, #tpu.memory_space<vmem>>, vector<8x32xf32>,
    %435 = arith.index_cast %408 : i32 to index
    %c0_181 = arith.constant 0 : index
    %436 = vector.load %arg25[%435, %c0_181] : memref<48x32xf32, #tpu.memory_space<vmem>>, vector<8x32xf32>
    tpu.vector_store %arg25[%435, %c0_181], %433 {strides = array<i32>} : memref<48x32xf32, #tpu.memory_space<vmem>>, vector<8x32xf32>,
    %c3_i32_182 = arith.constant 3 : i32
    %c8_i32_183 = arith.constant 8 : i32
    %437 = arith.muli %c3_i32_182, %c8_i32_183 : i32
    %438 = tpu.assume_multiple %437, 8 : i32
    %c0_184 = arith.constant 0 : index
    %c0_185 = arith.constant 0 : index
    %439 = vector.load %arg20[%c0_184, %c0_185] : memref<8x32xf32, #tpu.memory_space<vmem>>, vector<8x32xf32>
    %cst_186 = arith.constant dense<0.000000e+00> : vector<8x64xf32>
    %440 = tpu.matmul %439, %30, %cst_186 {dimension_numbers = #tpu.dot_dimension_numbers<[1], [0], [0], [1], [0, 0, 1, 1], [], []>} : vector<8x32xf32>, vector<32x64xf32>, vector<8x64xf32> -> vector<8x64xf32>
    %cst_187 = arith.constant dense<0.000000e+00> : vector<8x32xf32>
    %441 = tpu.matmul %439, %31, %cst_187 {dimension_numbers = #tpu.dot_dimension_numbers<[1], [0], [0], [1], [0, 0, 1, 1], [], []>} : vector<8x32xf32>, vector<32x32xf32>, vector<8x32xf32> -> vector<8x32xf32>
    %442 = vector.broadcast %32 : vector<1x32xf32> to vector<8x32xf32>
    %443 = arith.addf %441, %442 : vector<8x32xf32>
    %444 = arith.index_cast %438 : i32 to index
    %c0_188 = arith.constant 0 : index
    %445 = vector.load %arg23[%444, %c0_188] : memref<48x64xf32, #tpu.memory_space<vmem>>, vector<8x64xf32>
    %446 = arith.addf %445, %440 : vector<8x64xf32>
    %447 = arith.negf %446 : vector<8x64xf32>
    %448 = math.exp %447 : vector<8x64xf32>
    %cst_189 = arith.constant 1.000000e+00 : f32
    %449 = vector.broadcast %cst_189 : f32 to vector<8x64xf32>
    %450 = arith.addf %449, %448 : vector<8x64xf32>
    %451 = arith.divf %449, %450 : vector<8x64xf32>
    %452 = vector.extract_strided_slice %451 {offsets = [0, 0], sizes = [8, 32], strides = [1, 1]} : vector<8x64xf32> to vector<8x32xf32>
    %453 = vector.extract_strided_slice %451 {offsets = [0, 32], sizes = [8, 32], strides = [1, 1]} : vector<8x64xf32> to vector<8x32xf32>
    %454 = arith.index_cast %438 : i32 to index
    %c0_190 = arith.constant 0 : index
    %455 = vector.load %arg24[%454, %c0_190] : memref<48x32xf32, #tpu.memory_space<vmem>>, vector<8x32xf32>
    %456 = arith.mulf %452, %443 : vector<8x32xf32>
    %457 = arith.addf %455, %456 : vector<8x32xf32>
    %458 = math.tanh %457 : vector<8x32xf32>
    %cst_191 = arith.constant 1.000000e+00 : f32
    %459 = vector.broadcast %cst_191 : f32 to vector<8x32xf32>
    %460 = arith.subf %459, %453 : vector<8x32xf32>
    %461 = arith.mulf %460, %458 : vector<8x32xf32>
    %462 = arith.mulf %453, %439 : vector<8x32xf32>
    %463 = arith.addf %461, %462 : vector<8x32xf32>
    %c0_192 = arith.constant 0 : index
    %c0_193 = arith.constant 0 : index
    %464 = vector.load %arg20[%c0_192, %c0_193] : memref<8x32xf32, #tpu.memory_space<vmem>>, vector<8x32xf32>
    tpu.vector_store %arg20[%c0_192, %c0_193], %463 {strides = array<i32>} : memref<8x32xf32, #tpu.memory_space<vmem>>, vector<8x32xf32>,
    %465 = arith.index_cast %438 : i32 to index
    %c0_194 = arith.constant 0 : index
    %466 = vector.load %arg25[%465, %c0_194] : memref<48x32xf32, #tpu.memory_space<vmem>>, vector<8x32xf32>
    tpu.vector_store %arg25[%465, %c0_194], %463 {strides = array<i32>} : memref<48x32xf32, #tpu.memory_space<vmem>>, vector<8x32xf32>,
    %c4_i32_195 = arith.constant 4 : i32
    %c8_i32_196 = arith.constant 8 : i32
    %467 = arith.muli %c4_i32_195, %c8_i32_196 : i32
    %468 = tpu.assume_multiple %467, 8 : i32
    %c0_197 = arith.constant 0 : index
    %c0_198 = arith.constant 0 : index
    %469 = vector.load %arg20[%c0_197, %c0_198] : memref<8x32xf32, #tpu.memory_space<vmem>>, vector<8x32xf32>
    %cst_199 = arith.constant dense<0.000000e+00> : vector<8x64xf32>
    %470 = tpu.matmul %469, %30, %cst_199 {dimension_numbers = #tpu.dot_dimension_numbers<[1], [0], [0], [1], [0, 0, 1, 1], [], []>} : vector<8x32xf32>, vector<32x64xf32>, vector<8x64xf32> -> vector<8x64xf32>
    %cst_200 = arith.constant dense<0.000000e+00> : vector<8x32xf32>
    %471 = tpu.matmul %469, %31, %cst_200 {dimension_numbers = #tpu.dot_dimension_numbers<[1], [0], [0], [1], [0, 0, 1, 1], [], []>} : vector<8x32xf32>, vector<32x32xf32>, vector<8x32xf32> -> vector<8x32xf32>
    %472 = vector.broadcast %32 : vector<1x32xf32> to vector<8x32xf32>
    %473 = arith.addf %471, %472 : vector<8x32xf32>
    %474 = arith.index_cast %468 : i32 to index
    %c0_201 = arith.constant 0 : index
    %475 = vector.load %arg23[%474, %c0_201] : memref<48x64xf32, #tpu.memory_space<vmem>>, vector<8x64xf32>
    %476 = arith.addf %475, %470 : vector<8x64xf32>
    %477 = arith.negf %476 : vector<8x64xf32>
    %478 = math.exp %477 : vector<8x64xf32>
    %cst_202 = arith.constant 1.000000e+00 : f32
    %479 = vector.broadcast %cst_202 : f32 to vector<8x64xf32>
    %480 = arith.addf %479, %478 : vector<8x64xf32>
    %481 = arith.divf %479, %480 : vector<8x64xf32>
    %482 = vector.extract_strided_slice %481 {offsets = [0, 0], sizes = [8, 32], strides = [1, 1]} : vector<8x64xf32> to vector<8x32xf32>
    %483 = vector.extract_strided_slice %481 {offsets = [0, 32], sizes = [8, 32], strides = [1, 1]} : vector<8x64xf32> to vector<8x32xf32>
    %484 = arith.index_cast %468 : i32 to index
    %c0_203 = arith.constant 0 : index
    %485 = vector.load %arg24[%484, %c0_203] : memref<48x32xf32, #tpu.memory_space<vmem>>, vector<8x32xf32>
    %486 = arith.mulf %482, %473 : vector<8x32xf32>
    %487 = arith.addf %485, %486 : vector<8x32xf32>
    %488 = math.tanh %487 : vector<8x32xf32>
    %cst_204 = arith.constant 1.000000e+00 : f32
    %489 = vector.broadcast %cst_204 : f32 to vector<8x32xf32>
    %490 = arith.subf %489, %483 : vector<8x32xf32>
    %491 = arith.mulf %490, %488 : vector<8x32xf32>
    %492 = arith.mulf %483, %469 : vector<8x32xf32>
    %493 = arith.addf %491, %492 : vector<8x32xf32>
    %c0_205 = arith.constant 0 : index
    %c0_206 = arith.constant 0 : index
    %494 = vector.load %arg20[%c0_205, %c0_206] : memref<8x32xf32, #tpu.memory_space<vmem>>, vector<8x32xf32>
    tpu.vector_store %arg20[%c0_205, %c0_206], %493 {strides = array<i32>} : memref<8x32xf32, #tpu.memory_space<vmem>>, vector<8x32xf32>,
    %495 = arith.index_cast %468 : i32 to index
    %c0_207 = arith.constant 0 : index
    %496 = vector.load %arg25[%495, %c0_207] : memref<48x32xf32, #tpu.memory_space<vmem>>, vector<8x32xf32>
    tpu.vector_store %arg25[%495, %c0_207], %493 {strides = array<i32>} : memref<48x32xf32, #tpu.memory_space<vmem>>, vector<8x32xf32>,
    %c5_i32_208 = arith.constant 5 : i32
    %c8_i32_209 = arith.constant 8 : i32
    %497 = arith.muli %c5_i32_208, %c8_i32_209 : i32
    %498 = tpu.assume_multiple %497, 8 : i32
    %c0_210 = arith.constant 0 : index
    %c0_211 = arith.constant 0 : index
    %499 = vector.load %arg20[%c0_210, %c0_211] : memref<8x32xf32, #tpu.memory_space<vmem>>, vector<8x32xf32>
    %cst_212 = arith.constant dense<0.000000e+00> : vector<8x64xf32>
    %500 = tpu.matmul %499, %30, %cst_212 {dimension_numbers = #tpu.dot_dimension_numbers<[1], [0], [0], [1], [0, 0, 1, 1], [], []>} : vector<8x32xf32>, vector<32x64xf32>, vector<8x64xf32> -> vector<8x64xf32>
    %cst_213 = arith.constant dense<0.000000e+00> : vector<8x32xf32>
    %501 = tpu.matmul %499, %31, %cst_213 {dimension_numbers = #tpu.dot_dimension_numbers<[1], [0], [0], [1], [0, 0, 1, 1], [], []>} : vector<8x32xf32>, vector<32x32xf32>, vector<8x32xf32> -> vector<8x32xf32>
    %502 = vector.broadcast %32 : vector<1x32xf32> to vector<8x32xf32>
    %503 = arith.addf %501, %502 : vector<8x32xf32>
    %504 = arith.index_cast %498 : i32 to index
    %c0_214 = arith.constant 0 : index
    %505 = vector.load %arg23[%504, %c0_214] : memref<48x64xf32, #tpu.memory_space<vmem>>, vector<8x64xf32>
    %506 = arith.addf %505, %500 : vector<8x64xf32>
    %507 = arith.negf %506 : vector<8x64xf32>
    %508 = math.exp %507 : vector<8x64xf32>
    %cst_215 = arith.constant 1.000000e+00 : f32
    %509 = vector.broadcast %cst_215 : f32 to vector<8x64xf32>
    %510 = arith.addf %509, %508 : vector<8x64xf32>
    %511 = arith.divf %509, %510 : vector<8x64xf32>
    %512 = vector.extract_strided_slice %511 {offsets = [0, 0], sizes = [8, 32], strides = [1, 1]} : vector<8x64xf32> to vector<8x32xf32>
    %513 = vector.extract_strided_slice %511 {offsets = [0, 32], sizes = [8, 32], strides = [1, 1]} : vector<8x64xf32> to vector<8x32xf32>
    %514 = arith.index_cast %498 : i32 to index
    %c0_216 = arith.constant 0 : index
    %515 = vector.load %arg24[%514, %c0_216] : memref<48x32xf32, #tpu.memory_space<vmem>>, vector<8x32xf32>
    %516 = arith.mulf %512, %503 : vector<8x32xf32>
    %517 = arith.addf %515, %516 : vector<8x32xf32>
    %518 = math.tanh %517 : vector<8x32xf32>
    %cst_217 = arith.constant 1.000000e+00 : f32
    %519 = vector.broadcast %cst_217 : f32 to vector<8x32xf32>
    %520 = arith.subf %519, %513 : vector<8x32xf32>
    %521 = arith.mulf %520, %518 : vector<8x32xf32>
    %522 = arith.mulf %513, %499 : vector<8x32xf32>
    %523 = arith.addf %521, %522 : vector<8x32xf32>
    %c0_218 = arith.constant 0 : index
    %c0_219 = arith.constant 0 : index
    %524 = vector.load %arg20[%c0_218, %c0_219] : memref<8x32xf32, #tpu.memory_space<vmem>>, vector<8x32xf32>
    tpu.vector_store %arg20[%c0_218, %c0_219], %523 {strides = array<i32>} : memref<8x32xf32, #tpu.memory_space<vmem>>, vector<8x32xf32>,
    %525 = arith.index_cast %498 : i32 to index
    %c0_220 = arith.constant 0 : index
    %526 = vector.load %arg25[%525, %c0_220] : memref<48x32xf32, #tpu.memory_space<vmem>>, vector<8x32xf32>
    tpu.vector_store %arg25[%525, %c0_220], %523 {strides = array<i32>} : memref<48x32xf32, #tpu.memory_space<vmem>>, vector<8x32xf32>,
    %c6_i32_221 = arith.constant 6 : i32
    %c0_222 = arith.constant 0 : index
    %c0_223 = arith.constant 0 : index
    %527 = vector.load %arg25[%c0_222, %c0_223] : memref<48x32xf32, #tpu.memory_space<vmem>>, vector<48x32xf32>
    %c0_224 = arith.constant 0 : index
    %c0_225 = arith.constant 0 : index
    %528 = vector.load %arg17[%c0_224, %c0_225] : memref<32x128xf32, #tpu.memory_space<vmem>>, vector<32x128xf32>
    %cst_226 = arith.constant dense<0.000000e+00> : vector<48x128xf32>
    %529 = tpu.matmul %527, %528, %cst_226 {dimension_numbers = #tpu.dot_dimension_numbers<[1], [0], [0], [1], [0, 0, 1, 1], [], []>} : vector<48x32xf32>, vector<32x128xf32>, vector<48x128xf32> -> vector<48x128xf32>
    %cst_227 = arith.constant dense<0xFF800000> : vector<48xf32>
    %530 = vector.multi_reduction <maximumf>, %529, %cst_227 [1] : vector<48x128xf32> to vector<48xf32>
    %531 = vector.shape_cast %530 : vector<48xf32> to vector<48x1xf32>
    %532 = vector.broadcast %531 : vector<48x1xf32> to vector<48x128xf32>
    %533 = arith.subf %529, %532 : vector<48x128xf32>
    %534 = math.exp %533 : vector<48x128xf32>
    %cst_228 = arith.constant dense<0.000000e+00> : vector<48xf32>
    %535 = vector.multi_reduction <add>, %534, %cst_228 [1] : vector<48x128xf32> to vector<48xf32>
    %536 = vector.shape_cast %535 : vector<48xf32> to vector<48x1xf32>
    %537 = math.log %536 : vector<48x1xf32>
    %538 = arith.addf %537, %531 : vector<48x1xf32>
    %539 = vector.broadcast %538 : vector<48x1xf32> to vector<48x128xf32>
    %540 = arith.subf %529, %539 : vector<48x128xf32>
    %c0_229 = arith.constant 0 : index
    %c0_230 = arith.constant 0 : index
    %541 = vector.load %arg18[%c0_229, %c0_230] : memref<48x128xf32, #tpu.memory_space<vmem>>, vector<48x128xf32>
    tpu.vector_store %arg18[%c0_229, %c0_230], %540 {strides = array<i32>} : memref<48x128xf32, #tpu.memory_space<vmem>>, vector<48x128xf32>,
    %542 = tpu.iota {dimensions = array<i32: 1>} : vector<48x128xi32>
    %543 = vector.broadcast %531 : vector<48x1xf32> to vector<48x128xf32>
    %544 = arith.cmpf oeq, %529, %543 : vector<48x128xf32>
    %c128_i32 = arith.constant 128 : i32
    %545 = vector.broadcast %c128_i32 : i32 to vector<48x128xi32>
    %546 = arith.select %544, %542, %545 : vector<48x128xi1>, vector<48x128xi32>
    %cst_231 = arith.constant dense<2147483647> : vector<48xi32>
    %547 = vector.multi_reduction <minsi>, %546, %cst_231 [1] : vector<48x128xi32> to vector<48xi32>
    %548 = vector.shape_cast %547 : vector<48xi32> to vector<48x1xi32>
    %c0_232 = arith.constant 0 : index
    %c0_233 = arith.constant 0 : index
    %549 = vector.load %arg19[%c0_232, %c0_233] : memref<48x1xi32, #tpu.memory_space<vmem>>, vector<48x1xi32>
    tpu.vector_store %arg19[%c0_232, %c0_233], %548 {strides = array<i32>} : memref<48x1xi32, #tpu.memory_space<vmem>>, vector<48x1xi32>,
    return
  }
}

</mosaic_0001>

<bundles_post_ra>
// kernel: seq2seq_forward.1
= control target key start
LH: loop header
LB: loop body
LE: loop exit
PB: predicated region body
PF: predicated region fallthrough
CT: control target
= control target key end

     0   :  { %vm80_vm0 = vcmask 261120   ;;  %v4554_v3 = vmov 0.0   ;;  %v4555_v7 = vmov 0   ;;  %v4556_v41 = vmov 0.0|0.0   ;;  %s5401_s3 = inlined_call_operand.vmem [shape: f32[32,64], index: 3, kind: input, shape index: {}]   ;;  %s5402_s0 = inlined_call_operand.vmem [shape: f32[64,32], index: 0, kind: input, shape index: {}]   ;;  %s5403_s10 = inlined_call_operand.vmem [shape: f32[32,64], index: 10, kind: input, shape index: {}]   ;;  %s5404_s4 = inlined_call_operand.vmem [shape: f32[32,32], index: 4, kind: input, shape index: {}]   ;;  %s5405_s11 = inlined_call_operand.vmem [shape: f32[32,32], index: 11, kind: input, shape index: {}]   ;;  %s5406_s2 = inlined_call_operand.vmem [shape: s32[8,1], index: 2, kind: input, shape index: {}]   ;;  %s5407_s1 = inlined_call_operand.vmem [shape: f32[48,32], index: 1, kind: input, shape index: {}]   ;;  %s5408_s5 = inlined_call_operand.vmem [shape: f32[32,64], index: 5, kind: input, shape index: {}]   ;;  %s5409_s6 = inlined_call_operand.vmem [shape: f32[32,32], index: 6, kind: input, shape index: {}]   ;;  %s5410_s7 = inlined_call_operand.vmem [shape: f32[1,64], index: 7, kind: input, shape index: {}]   ;;  %s5411_s14 = inlined_call_operand.vmem [shape: f32[1,64], index: 14, kind: input, shape index: {}]   ;;  %s5412_s8 = inlined_call_operand.vmem [shape: f32[1,32], index: 8, kind: input, shape index: {}]   ;;  %s5413_s15 = inlined_call_operand.vmem [shape: f32[1,32], index: 15, kind: input, shape index: {}]   ;;  %s5414_s9 = inlined_call_operand.vmem [shape: f32[1,32], index: 9, kind: input, shape index: {}]   ;;  %s5415_s12 = inlined_call_operand.vmem [shape: f32[32,64], index: 12, kind: input, shape index: {}]   ;;  %s5416_s13 = inlined_call_operand.vmem [shape: f32[32,32], index: 13, kind: input, shape index: {}]   ;;  %s5417_s16 = inlined_call_operand.vmem [shape: f32[1,32], index: 16, kind: input, shape index: {}]   ;;  %s5418_s17 = inlined_call_operand.vmem [shape: f32[32,128], index: 17, kind: input, shape index: {}]   ;;  %s5419_s19 = inlined_call_operand.vmem [shape: s32[48,1], index: 19, kind: output, shape index: {1}]   ;;  %s5420_s18 = inlined_call_operand.vmem [shape: f32[48,128], index: 18, kind: output, shape index: {0}]  }
   0x1   :  { %5425 = sst [smem:[#allocation8_spill]] %s5401_s3  ;;  %610 = vst.msk [vmem:[#allocation2] sm:$0xff] %vm80_vm0, %v4554_v3  ;;  %4443 = vset.pattern.permute.xlu0 %v4555_v7  ;;  %4444 = vset.pattern.permute.xlu1 %v4555_v7  ;;  %v479_v26 = vld [vmem:[%s5405_s11] sm:$0xff]  ;;  %v480_v27 = vld [vmem:[%s5405_s11 + $0x8] sm:$0xff]  ;;  %v481_v39 = vld [vmem:[%s5405_s11 + $0x10] sm:$0xff]  ;;  %vm4557_vm2 = vmmov 0  }
   0x2   :  { %5426 = sst [smem:[#allocation9_spill]] %s5402_s0  ;;  %s5429_s20 = sld [smem:[#allocation8_spill]]  ;;  %v4740_v28 = vld [vmem:[%s5406_s2] sm:$0xff]  ;;  %v593_v33 = vld [vmem:[%s5408_s5 + $0x8] sm:$0xff]  ;;  %v4249_v35 = vpack.c.bf16 %v480_v27, %v479_v26  ;;  %v482_v40 = vld [vmem:[%s5405_s11 + $0x18] sm:$0xff]  ;;  %vm210_vm4 = vcmask 523264  }
   0x3   :  { %5427 = sst [smem:[#allocation10_spill]] %s5403_s10  ;;  %s5430_s26 = sld [smem:[#allocation9_spill]]  ;;  %vm784_vm1 = vcmp.gt.s32.totalorder %v4740_v28, 0  ;;  %v343_v31 = vld [vmem:[%s5407_s1] sm:$0xff]  ;;  %v344_v37 = vld [vmem:[%s5407_s1 + $0x8] sm:$0xff]  ;;  %v345_v42 = vld [vmem:[%s5407_s1 + $0x10] sm:$0xff]  ;;  %v4253_v45 = vpack.c.bf16 %v482_v40, %v481_v39 }
   0x4   :  { %5428 = sst [smem:[#allocation11_spill]] %s5404_s4  ;;  %s5431_s29 = sld [smem:[#allocation10_spill]]  ;;  %v592_v32 = vld [vmem:[%s5408_s5] sm:$0xff]  ;;  %v3578_v34 = vsel %vm784_vm1, 1.0, %v4554_v3  ;;  %v594_v43 = vld [vmem:[%s5408_s5 + $0x10] sm:$0xff]  ;;  %v595_v44 = vld [vmem:[%s5408_s5 + $0x18] sm:$0xff] }
   0x5   :  { %s5432_s4 = sld [smem:[#allocation11_spill]]  ;;  %v793_v36 = vsub.f32 1.0, %v3578_v34  ;;  %v4771_v38 = vpack.c.bf16 %v593_v33, %v592_v32  ;;  %v346_v46 = vld [vmem:[%s5407_s1 + $0x18] sm:$0xff]  ;;  %v4797_v47 = vpack.c.bf16 %v595_v44, %v594_v43  ;;  %v347_v48 = vld [vmem:[%s5407_s1 + $0x20] sm:$0xff]  ;;  %v348_v49 = vld [vmem:[%s5407_s1 + $0x28] sm:$0xff]  ;;  %vm979_vm3 = vcmp.gt.s32.totalorder %v4740_v28, 1 }
   0x6   :  { %v596_v51 = vld [vmem:[%s5409_s6] sm:$0xff]  ;;  %v597_v52 = vld [vmem:[%s5409_s6 + $0x8] sm:$0xff]  ;;  %v598_v54 = vld [vmem:[%s5409_s6 + $0x10] sm:$0xff]  ;;  %v4873_v58 = vsel %vm979_vm3, 1.0, %v4554_v3  ;;  %vm1174_vm5 = vcmp.gt.s32.totalorder %v4740_v28, 2  ;;  %vm1369_vm6 = vcmp.gt.s32.totalorder %v4740_v28, 3 }
   0x7   :  { %796 = vperm.xlu0 %4443, %v793_v36   ;;  %v4840_v53 = vpack.c.bf16 %v597_v52, %v596_v51  ;;  %v599_v55 = vld [vmem:[%s5409_s6 + $0x18] sm:$0xff]  ;;  %s4558_s6 = smov 32   ;;  %v988_v60 = vsub.f32 1.0, %v4873_v58  ;;  %v3542_v61 = vld [vmem:[%s5410_s7] ss:$0 sm:$0xff]  ;;  %vm1564_vm7 = vcmp.gt.s32.totalorder %v4740_v28, 4 }
   0x8   :  { %v69_v0 = vld [vmem:[%s5429_s20] sm:$0xff]  ;;  %v70_v1 = vld [vmem:[%s5429_s20 + $0x8] sm:$0xff]  ;;  %v71_v2 = vld [vmem:[%s5429_s20 + $0x10] sm:$0xff]  ;;  %v4853_v56 = vpack.c.bf16 %v599_v55, %v598_v54  ;;  %vm1759_vm8 = vcmp.gt.s32.totalorder %v4740_v28, 5  ;;  %vm1954_vm9 = vcmp.gt.s32.totalorder %v4740_v28, 6 }
   0x9   :  { %v4225_v4 = vpack.c.bf16 %v70_v1, %v69_v0  ;;  %v72_v5 = vld [vmem:[%s5429_s20 + $0x18] sm:$0xff]  ;;  %v4677_v6 = vld [vmem:[%s5430_s26] sm:$0xff]  ;;  %v62_v17 = vld [vmem:[%s5430_s26 + $0x8] sm:$0xff] }
   0xa   :  { %v4229_v8 = vpack.c.bf16 %v72_v5, %v71_v2  ;;  %3834 = vmatprep.mubr.msk.f32.mxu0 %vm80_vm0, %v4677_v6  ;;  %v349_v9 = vld [vmem:[%s5431_s29] sm:$0xff]  ;;  %v350_v10 = vld [vmem:[%s5431_s29 + $0x8] sm:$0xff]  ;;  %v351_v13 = vld [vmem:[%s5431_s29 + $0x10] sm:$0xff] }
   0xb   :  { %4226 = vmatprep.subr.bf16.mxu0 %v4225_v4  ;;  %4433 = vmatprep.subr.bf16.mxu1 %v4225_v4  ;;  %v4690_v11 = vld [vmem:[%s5430_s26 + $0x20] sm:$0xff]  ;;  %v4241_v12 = vpack.c.bf16 %v350_v10, %v349_v9  ;;  %v352_v14 = vld [vmem:[%s5431_s29 + $0x18] sm:$0xff]  ;;  %v220_v16 = vld [vmem:[%s5432_s4 + $0x8] sm:$0xff] }
   0xc   :  { %4228 = vmatpush3.bf16.msra.mxu0 %v4225_v4  ;;  %4435 = vmatpush3.bf16.msra.mxu1 %v4225_v4  ;;  %v219_v15 = vld [vmem:[%s5432_s4] sm:$0xff]  ;;  %v4712_v19 = vld [vmem:[%s5430_s26 + $0x28] sm:$0xff]  ;;  %v221_v20 = vld [vmem:[%s5432_s4 + $0x10] sm:$0xff]  ;;  %v4245_v23 = vpack.c.bf16 %v352_v14, %v351_v13 }
   0xd   :  { %4230 = vmatprep.subr.bf16.mxu0 %v4229_v8  ;;  %4434 = vmatprep.subr.bf16.mxu1 %v4229_v8  ;;  %v4233_v18 = vpack.c.bf16 %v220_v16, %v219_v15  ;;  %v222_v21 = vld [vmem:[%s5432_s4 + $0x18] sm:$0xff]  ;;  %v63_v22 = vld [vmem:[%s5430_s26 + $0x10] sm:$0xff]  ;;  %v4818_v50 = vld [vmem:[#allocation2] sm:$0xff] }
   0xe   :  { %3840 = vmatprep.mubr.msk.f32.mxu1 %vm80_vm0, %v4690_v11  ;;  %v4726_v24 = vld [vmem:[%s5430_s26 + $0x30] sm:$0xff]  ;;  %v4237_v25 = vpack.c.bf16 %v222_v21, %v221_v20  ;;  %v64_v29 = vld [vmem:[%s5430_s26 + $0x18] sm:$0xff]  ;;  %789 = vperm.xlu0 %4443, %v3578_v34   ;;  %v3560_v14 = vld [vmem:[%s5411_s14] ss:$0 sm:$0xff] }
   0xf   :  { %v4749_v30 = vld [vmem:[%s5430_s26 + $0x38] sm:$0xff] }
  0x10   :  { %4232 = vmatpush3.bf16.msra.mxu0 %v4229_v8  ;;  %4436 = vmatpush3.bf16.msra.mxu1 %v4229_v8 }
  0x11   :  { %4242 = vmatprep.subr.bf16.mxu0 %v4241_v12  ;;  %4234 = vmatprep.subr.bf16.mxu1 %v4233_v18 }
  0x13   :  { %3835 = vmatmul.mubr.msk.f32.vlgmr.msra.gmra.mrb[0].mxu0 %vm80_vm0, %v62_v17  ;;  %3841 = vmatmul.mubr.msk.f32.vlgmr.msra.gmra.mrb[0].mxu1 %vm80_vm0, %v4712_v19 }
  0x14   :  { %4244 = vmatpush3.bf16.msra.mxu0 %v4241_v12  ;;  %3837 = vmatprep.mubr.msk.f32.mxu0 %vm80_vm0, %v63_v22 }
  0x15   :  { %4246 = vmatprep.subr.bf16.mxu0 %v4245_v23  ;;  %4236 = vmatpush3.bf16.msra.mxu1 %v4233_v18 }
  0x16   :  { %3843 = vmatprep.mubr.msk.f32.mxu1 %vm80_vm0, %v4726_v24  ;;  %4238 = vmatprep.subr.bf16.mxu1 %v4237_v25 }
  0x17   :  { %3838 = vmatmul.mubr.msk.f32.gmra.mrb[2].mxu0 %vm80_vm0, %v64_v29  ;;  %3844 = vmatmul.mubr.msk.f32.gmra.mrb[2].mxu1 %vm80_vm0, %v4749_v30 }
  0x18   :  { %4248 = vmatpush3.bf16.msra.mxu0 %v4245_v23  ;;  %3874 = vmatprep.mubr.msk.f32.mxu0 %vm80_vm0, %v343_v31 }
  0x19   :  { %4257 = vmatprep.subr.bf16.mxu0 %v4556_v41  ;;  %4240 = vmatpush3.bf16.msra.mxu1 %v4237_v25 }
  0x1a   :  { %3854 = vmatprep.mubr.msk.f32.mxu1 %vm80_vm0, %v4677_v6  ;;  %4250 = vmatprep.subr.bf16.mxu1 %v4249_v35 }
  0x1b   :  { %3875 = vmatmul.mubr.msk.f32.vlgmr.msra.gmra.mrb[4].mxu0 %vm80_vm0, %v344_v37 }
  0x1c   :  { %4259 = vmatpush3.bf16.msra.mxu0 %v4771_v38  ;;  %3877 = vmatprep.mubr.msk.f32.mxu0 %vm80_vm0, %v345_v42 }
  0x1d   :  { %4260 = vmatprep.subr.bf16.mxu0 %v4556_v41  ;;  %3855 = vmatmul.mubr.msk.f32.vlgmr.msra.gmra.mrb[4].mxu1 %vm80_vm0, %v62_v17  ;;  %v3551_v17 = vld [vmem:[%s5412_s8] ss:$0 sm:$0xff] }
  0x1e   :  { %4252 = vmatpush3.bf16.msra.mxu1 %v4249_v35  ;;  %3857 = vmatprep.mubr.msk.f32.mxu1 %vm80_vm0, %v63_v22 }
  0x1f   :  { %3878 = vmatmul.mubr.msk.f32.gmra.mrb[6].mxu0 %vm80_vm0, %v346_v46  ;;  %4254 = vmatprep.subr.bf16.mxu1 %v4253_v45 }
  0x20   :  { %3880 = vmatprep.mubr.msk.f32.mxu0 %vm80_vm0, %v347_v48  ;;  %4262 = vmatpush3.bf16.msra.mxu0 %v4797_v47 }
  0x21   :  { %3858 = vmatmul.mubr.msk.f32.gmra.mrb[6].mxu1 %vm80_vm0, %v64_v29  ;;  %4269 = vmatprep.subr.bf16.mxu0 %v4556_v41 }
  0x22   :  { %3860 = vmatprep.mubr.msk.f32.mxu1 %vm80_vm0, %v4690_v11  ;;  %4256 = vmatpush3.bf16.msra.mxu1 %v4253_v45 }
  0x23   :  { %3881 = vmatmul.mubr.msk.f32.gmra.mrb[8].mxu0 %vm80_vm0, %v348_v49  ;;  %4263 = vmatprep.subr.bf16.mxu1 %v4556_v41 }
  0x24   :  { %3908 = vmatprep.mubr.msk.f32.mxu0 %vm4557_vm2, %v4554_v3 }
  0x25   :  { %3861 = vmatmul.mubr.msk.f32.gmra.mrb[8].mxu1 %vm80_vm0, %v4712_v19 }
  0x26   :  { %3863 = vmatprep.mubr.msk.f32.mxu1 %vm80_vm0, %v4726_v24 }
  0x27   :  { %3909 = vmatmul.mubr.msk.f32.vlgmr.msra.gmra.mrb[10].mxu0 %vm80_vm0, %v4818_v50 }
  0x28   :  { %4271 = vmatpush3.bf16.msra.mxu0 %v4771_v38  ;;  %3930 = vmatprep.mubr.msk.f32.mxu0 %vm4557_vm2, %v4554_v3 }
  0x29   :  { %3864 = vmatmul.mubr.msk.f32.gmra.mrb[10].mxu1 %vm80_vm0, %v4749_v30  ;;  %4272 = vmatprep.subr.bf16.mxu0 %v4556_v41 }
  0x2a   :  { %3891 = vmatprep.mubr.msk.f32.mxu1 %vm80_vm0, %v343_v31 }
  0x2c   :  { %4274 = vmatpush3.bf16.msra.mxu0 %v4797_v47 }
  0x2d   :  { %3892 = vmatmul.mubr.msk.f32.vlgmr.msra.gmra.mrb[12].mxu1 %vm80_vm0, %v344_v37  ;;  %4281 = vmatprep.subr.bf16.mxu0 %v4556_v41 }
  0x2e   :  { %4265 = vmatpush3.bf16.msra.mxu1 %v4840_v53  ;;  %3894 = vmatprep.mubr.msk.f32.mxu1 %vm80_vm0, %v345_v42 }
  0x2f   :  { %4266 = vmatprep.subr.bf16.mxu1 %v4556_v41 }
  0x31   :  { %3895 = vmatmul.mubr.msk.f32.gmra.mrb[14].mxu1 %vm80_vm0, %v346_v46 }
  0x32   :  { %3897 = vmatprep.mubr.msk.f32.mxu1 %vm80_vm0, %v347_v48  ;;  %4268 = vmatpush3.bf16.msra.mxu1 %v4853_v56 }
  0x33   :  { %4275 = vmatprep.subr.bf16.mxu1 %v4556_v41 }
  0x35   :  { %3898 = vmatmul.mubr.msk.f32.gmra.mrb[16].mxu1 %vm80_vm0, %v348_v49 }
  0x36   :  { %3919 = vmatprep.mubr.msk.f32.mxu1 %vm4557_vm2, %v4554_v3 }
  0x39   :  { %3920 = vmatmul.mubr.msk.f32.vlgmr.msra.gmra.mrb[18].mxu1 %vm80_vm0, %v4818_v50 }
  0x3a   :  { %4277 = vmatpush3.bf16.msra.mxu1 %v4840_v53  ;;  %3941 = vmatprep.mubr.msk.f32.mxu1 %vm4557_vm2, %v4554_v3 }
  0x3b   :  { %4278 = vmatprep.subr.bf16.mxu1 %v4556_v41 }
  0x3e   :  { %4280 = vmatpush3.bf16.msra.mxu1 %v4853_v56 }
  0x3f   :  { %4287 = vmatprep.subr.bf16.mxu1 %v4556_v41 }
  0x86   :  { %v797_v57 = vpop.permute.xlu0 %796 }
  0x87   :  { %v799_v59 = vmul.f32 %v797_v57, %v4818_v50  ;;  %v3567_v57 = vld [vmem:[%s5413_s15] ss:$0 sm:$0xff] }
  0x89   :  { %801 = vrot.lane.b32.xlu0 %v799_v59, %s4558_s6 }
  0x8d   :  { %991 = vperm.xlu0 %4443, %v988_v60  }
  0xe6   :  { %v3836_v62 = vpop.f32.mrb[0].mxu0  ;;  %v3842_v63 = vpop.f32.mrb[0].mxu1 }
  0xe7   :  { %v177_v0 = vadd.f32 %v3836_v62, %v3542_v61  ;;  %v171_v1 = vpop.f32.mrb[1].mxu0  ;;  %v197_v2 = vadd.f32 %v3842_v63, %v3542_v61  ;;  %v191_v4 = vpop.f32.mrb[1].mxu1 }
  0xe8   :  { %v172_v5 = vadd.f32 %v3542_v61, %v171_v1  ;;  %v192_v6 = vadd.f32 %v3542_v61, %v191_v4 }
  0xe9   :  { %212 = vst.msk [vmem:[#allocation3 + $0x8] sm:$0xff] %vm210_vm4, %v177_v0  ;;  %216 = vst.msk [vmem:[#allocation3 + $0x28] sm:$0xff] %vm210_vm4, %v197_v2 }
  0xea   :  { %211 = vst.msk [vmem:[#allocation3] sm:$0xff] %vm210_vm4, %v172_v5  ;;  %v3839_v7 = vpop.f32.mrb[2].mxu0  ;;  %215 = vst.msk [vmem:[#allocation3 + $0x20] sm:$0xff] %vm210_vm4, %v192_v6  ;;  %v3845_v8 = vpop.f32.mrb[2].mxu1 }
  0xeb   :  { %v187_v9 = vadd.f32 %v3839_v7, %v3542_v61  ;;  %v181_v10 = vpop.f32.mrb[3].mxu0  ;;  %v207_v11 = vadd.f32 %v3845_v8, %v3542_v61  ;;  %v201_v12 = vpop.f32.mrb[3].mxu1 }
  0xec   :  { %v182_v13 = vadd.f32 %v3542_v61, %v181_v10  ;;  %v202_v15 = vadd.f32 %v3542_v61, %v201_v12  ;;  %v4921_v12 = vld [vmem:[%s5414_s9] ss:$0 sm:$0xff]  ;;  %s4559_s9 = smov 96  }
  0xed   :  { %214 = vst.msk [vmem:[#allocation3 + $0x18] sm:$0xff] %vm210_vm4, %v187_v9  ;;  %218 = vst.msk [vmem:[#allocation3 + $0x38] sm:$0xff] %vm210_vm4, %v207_v11 }
  0xee   :  { %213 = vst.msk [vmem:[#allocation3 + $0x10] sm:$0xff] %vm210_vm4, %v182_v13  ;;  %v3876_v16 = vpop.f32.mrb[4].mxu0  ;;  %217 = vst.msk [vmem:[#allocation3 + $0x30] sm:$0xff] %vm210_vm4, %v202_v15 }
  0xef   :  { %v450_v18 = vadd.f32 %v3876_v16, %v3560_v14  ;;  %v444_v19 = vpop.f32.mrb[5].mxu0 }
  0xf0   :  { %v445_v20 = vadd.f32 %v3560_v14, %v444_v19  ;;  %v3856_v21 = vpop.f32.mrb[4].mxu1 }
  0xf1   :  { %474 = vst.msk [vmem:[#allocation5 + $0x8] sm:$0xff] %vm210_vm4, %v450_v18  ;;  %v302_v22 = vadd.f32 %v3856_v21, %v3551_v17  ;;  %v296_v23 = vpop.f32.mrb[5].mxu1  ;;  %v761_v44 = vld [vmem:[#allocation3] sm:$0xff]  ;;  %v790_v21 = vpop.permute.xlu0 %789 }
  0xf2   :  { %473 = vst.msk [vmem:[#allocation5] sm:$0xff] %vm210_vm4, %v445_v20  ;;  %v3879_v24 = vpop.f32.mrb[6].mxu0  ;;  %v297_v25 = vadd.f32 %v3551_v17, %v296_v23 }
  0xf3   :  { %v460_v26 = vadd.f32 %v3879_v24, %v3560_v14  ;;  %v454_v27 = vpop.f32.mrb[7].mxu0  ;;  %336 = vst.msk [vmem:[#allocation4 + $0x8] sm:$0xff] %vm80_vm0, %v302_v22 }
  0xf4   :  { %v455_v29 = vadd.f32 %v3560_v14, %v454_v27  ;;  %335 = vst.msk [vmem:[#allocation4] sm:$0xff] %vm80_vm0, %v297_v25  ;;  %v3859_v30 = vpop.f32.mrb[6].mxu1 }
  0xf5   :  { %476 = vst.msk [vmem:[#allocation5 + $0x18] sm:$0xff] %vm210_vm4, %v460_v26  ;;  %v312_v31 = vadd.f32 %v3859_v30, %v3551_v17  ;;  %v306_v32 = vpop.f32.mrb[7].mxu1 }
  0xf6   :  { %475 = vst.msk [vmem:[#allocation5 + $0x10] sm:$0xff] %vm210_vm4, %v455_v29  ;;  %v3882_v33 = vpop.f32.mrb[8].mxu0  ;;  %v307_v34 = vadd.f32 %v3551_v17, %v306_v32 }
  0xf7   :  { %v470_v35 = vadd.f32 %v3882_v33, %v3560_v14  ;;  %v464_v36 = vpop.f32.mrb[9].mxu0  ;;  %338 = vst.msk [vmem:[#allocation4 + $0x18] sm:$0xff] %vm80_vm0, %v312_v31 }
  0xf8   :  { %v465_v37 = vadd.f32 %v3560_v14, %v464_v36  ;;  %337 = vst.msk [vmem:[#allocation4 + $0x10] sm:$0xff] %vm80_vm0, %v307_v34  ;;  %v3862_v39 = vpop.f32.mrb[8].mxu1 }
  0xf9   :  { %478 = vst.msk [vmem:[#allocation5 + $0x28] sm:$0xff] %vm210_vm4, %v470_v35  ;;  %v322_v40 = vadd.f32 %v3862_v39, %v3551_v17  ;;  %v316_v42 = vpop.f32.mrb[9].mxu1 }
  0xfa   :  { %477 = vst.msk [vmem:[#allocation5 + $0x20] sm:$0xff] %vm210_vm4, %v465_v37  ;;  %v681_v43 = vpop.f32.mrb[10].mxu0  ;;  %v317_v45 = vadd.f32 %v3551_v17, %v316_v42 }
  0xfb   :  { %v762_v46 = vadd.f32 %v761_v44, %v681_v43  ;;  %v3910_v48 = vpop.f32.mrb[11].mxu0  ;;  %340 = vst.msk [vmem:[#allocation4 + $0x28] sm:$0xff] %vm80_vm0, %v322_v40  ;;  %v769_v16 = vld [vmem:[#allocation4] sm:$0xff]  ;;  %v802_v27 = vpop.permute.xlu0 %801  ;;  %v964_v44 = vld [vmem:[#allocation4 + $0x8] sm:$0xff] }
  0xfc   :  { %339 = vst.msk [vmem:[#allocation4 + $0x20] sm:$0xff] %vm80_vm0, %v317_v45  ;;  %v3865_v49 = vpop.f32.mrb[10].mxu1 }
  0xfd   :  { %v3577_v51 = vmul.f32 -1.442695, %v762_v46  ;;  %v332_v52 = vadd.f32 %v3865_v49, %v3551_v17  ;;  %v326_v54 = vpop.f32.mrb[11].mxu1  ;;  %v3586_v49 = vsel %vm1174_vm5, 1.0, %v4554_v3 }
  0xfe   :  { %v327_v55 = vadd.f32 %v3551_v17, %v326_v54 }
  0xff   :  { %4445 = vpow2.f32 %v3577_v51  ;;  %342 = vst.msk [vmem:[#allocation4 + $0x38] sm:$0xff] %vm80_vm0, %v332_v52  ;;  %v1183_v52 = vsub.f32 1.0, %v3586_v49 }
 0x100   :  { %341 = vst.msk [vmem:[#allocation4 + $0x30] sm:$0xff] %vm80_vm0, %v327_v55  ;;  %v3893_v59 = vpop.f32.mrb[12].mxu1 }
 0x101   :  { %v562_v60 = vadd.f32 %v3893_v59, %v3567_v57  ;;  %v556_v61 = vpop.f32.mrb[13].mxu1 }
 0x102   :  { %v557_v62 = vadd.f32 %v3567_v57, %v556_v61 }
 0x103   :  { %586 = vst.msk [vmem:[#allocation6 + $0x8] sm:$0xff] %vm80_vm0, %v562_v60 }
 0x104   :  { %585 = vst.msk [vmem:[#allocation6] sm:$0xff] %vm80_vm0, %v557_v62  ;;  %v3896_v63 = vpop.f32.mrb[14].mxu1 }
 0x105   :  { %v572_v0 = vadd.f32 %v3896_v63, %v3567_v57  ;;  %v566_v1 = vpop.f32.mrb[15].mxu1 }
 0x106   :  { %v567_v2 = vadd.f32 %v3567_v57, %v566_v1 }
 0x107   :  { %588 = vst.msk [vmem:[#allocation6 + $0x18] sm:$0xff] %vm80_vm0, %v572_v0 }
 0x108   :  { %587 = vst.msk [vmem:[#allocation6 + $0x10] sm:$0xff] %vm80_vm0, %v567_v2  ;;  %v3899_v4 = vpop.f32.mrb[16].mxu1 }
 0x109   :  { %v4446_v5 = vpop.eup %4445  ;;  %v582_v6 = vadd.f32 %v3899_v4, %v3567_v57  ;;  %v576_v7 = vpop.f32.mrb[17].mxu1 }
 0x10a   :  { %v766_v8 = vadd.f32 1.0, %v4446_v5  ;;  %v577_v9 = vadd.f32 %v3567_v57, %v576_v7 }
 0x10b   :  { %590 = vst.msk [vmem:[#allocation6 + $0x28] sm:$0xff] %vm80_vm0, %v582_v6  ;;  %v1150_v6 = vld [vmem:[#allocation3 + $0x10] sm:$0xff] }
 0x10c   :  { %4447 = vrcp.f32 %v766_v8  ;;  %589 = vst.msk [vmem:[#allocation6 + $0x20] sm:$0xff] %vm80_vm0, %v577_v9  ;;  %v757_v10 = vpop.f32.mrb[18].mxu1  ;;  %v992_v48 = vpop.permute.xlu0 %991 }
 0x10d   :  { %v3921_v11 = vpop.f32.mrb[19].mxu1  ;;  %v758_v13 = vadd.f32 %v4921_v12, %v757_v10 }
 0x116   :  { %v4448_v14 = vpop.eup %4447 }
 0x117   :  { %v770_v15 = vmul.f32 %v4448_v14, %v758_v13  ;;  %v773_v20 = vsub.f32 1.0, %v4448_v14 }
 0x119   :  { %v771_v17 = vadd.f32 %v770_v15, %v769_v16 }
 0x11b   :  { %4449 = vtanh.f32 %v771_v17 }
 0x125   :  { %v4450_v18 = vpop.eup %4449 }
 0x126   :  { %775 = vrot.lane.b32.xlu1 %v4450_v18, %s4558_s6  ;;  %v1159_v18 = vld [vmem:[#allocation4 + $0x10] sm:$0xff] }
 0x12a   :  { %779 = vrot.lane.b32.xlu1 %v4818_v50, %s4558_s6 }
 0x198   :  { %v776_v19 = vpop.permute.xlu1 %775 }
 0x199   :  { %v778_v23 = vmul.f32 %v776_v19, %v773_v20 }
 0x19c   :  { %v780_v22 = vpop.permute.xlu1 %779 }
 0x19d   :  { %v782_v24 = vmul.f32 %v4448_v14, %v780_v22  ;;  %v3590_v22 = vsel %vm1369_vm6, 1.0, %v4554_v3 }
 0x19f   :  { %v783_v25 = vadd.f32 %v782_v24, %v778_v23  ;;  %v1378_v24 = vsub.f32 1.0, %v3590_v22 }
 0x1a1   :  { %v792_v26 = vmul.f32 %v790_v21, %v783_v25 }
 0x1a3   :  { %v804_v29 = vadd.f32 %v802_v27, %v792_v26 }
 0x1a5   :  { %806 = vrot.lane.b32.xlu1 %v804_v29, %s4559_s9 }
 0x1a9   :  { %984 = vperm.xlu1 %4444, %v4873_v58   ;;  %v955_v58 = vld [vmem:[#allocation3 + $0x8] sm:$0xff] }
 0x217   :  { %v807_v30 = vpop.permute.xlu1 %806 }
 0x218   :  { %809 = vst.msk [vmem:[#allocation2] sm:$0xff] %vm80_vm0, %v807_v30 }
 0x21f   :  { %v810_v31 = vld [vmem:[#allocation2] sm:$0xff] }
 0x220   :  { %974 = vrot.lane.b32.xlu1 %v810_v31, %s4558_s6  ;;  %3931 = vmatmul.mubr.msk.f32.vlgmr.msra.gmra.mrb[12].mxu0 %vm80_vm0, %v810_v31  ;;  %v994_v51 = vmul.f32 %v992_v48, %v810_v31 }
 0x221   :  { %3942 = vmatmul.mubr.msk.f32.vlgmr.msra.gmra.mrb[20].mxu1 %vm80_vm0, %v810_v31  ;;  %4283 = vmatpush3.bf16.msra.mxu0 %v4771_v38 }
 0x222   :  { %4289 = vmatpush3.bf16.msra.mxu1 %v4840_v53  ;;  %4284 = vmatprep.subr.bf16.mxu0 %v4556_v41 }
 0x223   :  { %4290 = vmatprep.subr.bf16.mxu1 %v4556_v41  ;;  %3952 = vmatprep.mubr.msk.f32.mxu0 %vm4557_vm2, %v4554_v3 }
 0x224   :  { %3963 = vmatprep.mubr.msk.f32.mxu1 %vm4557_vm2, %v4554_v3 }
 0x225   :  { %4286 = vmatpush3.bf16.msra.mxu0 %v4797_v47 }
 0x226   :  { %4292 = vmatpush3.bf16.msra.mxu1 %v4853_v56  ;;  %4293 = vmatprep.subr.bf16.mxu0 %v4556_v41 }
 0x227   :  { %4299 = vmatprep.subr.bf16.mxu1 %v4556_v41 }
 0x228   :  { %v985_v54 = vpop.permute.xlu1 %984 }
 0x292   :  { %v975_v57 = vpop.permute.xlu1 %974 }
 0x2f3   :  { %v880_v50 = vpop.f32.mrb[12].mxu0 }
 0x2f4   :  { %v956_v32 = vadd.f32 %v955_v58, %v880_v50  ;;  %v950_v33 = vpop.f32.mrb[20].mxu1  ;;  %v3932_v34 = vpop.f32.mrb[13].mxu0 }
 0x2f5   :  { %v3943_v35 = vpop.f32.mrb[21].mxu1  ;;  %v951_v40 = vadd.f32 %v4921_v12, %v950_v33 }
 0x2f6   :  { %v3581_v36 = vmul.f32 -1.442695, %v956_v32 }
 0x2f8   :  { %4451 = vpow2.f32 %v3581_v36 }
 0x302   :  { %v4452_v37 = vpop.eup %4451 }
 0x303   :  { %v960_v39 = vadd.f32 1.0, %v4452_v37  ;;  %v1345_v37 = vld [vmem:[#allocation3 + $0x18] sm:$0xff] }
 0x305   :  { %4453 = vrcp.f32 %v960_v39 }
 0x30f   :  { %v4454_v42 = vpop.eup %4453 }
 0x310   :  { %v965_v43 = vmul.f32 %v4454_v42, %v951_v40  ;;  %v968_v55 = vsub.f32 1.0, %v4454_v42  ;;  %v977_v61 = vmul.f32 %v4454_v42, %v975_v57 }
 0x312   :  { %v966_v45 = vadd.f32 %v965_v43, %v964_v44 }
 0x314   :  { %4455 = vtanh.f32 %v966_v45 }
 0x31e   :  { %v4456_v46 = vpop.eup %4455 }
 0x31f   :  { %970 = vrot.lane.b32.xlu0 %v4456_v46, %s4558_s6 }
 0x323   :  { %996 = vrot.lane.b32.xlu0 %v994_v51, %s4558_s6 }
 0x327   :  { %1186 = vperm.xlu0 %4443, %v1183_v52   ;;  %v1354_v52 = vld [vmem:[#allocation4 + $0x18] sm:$0xff] }
 0x391   :  { %v971_v59 = vpop.permute.xlu0 %970 }
 0x392   :  { %v973_v60 = vmul.f32 %v971_v59, %v968_v55  ;;  %v3594_v59 = vsel %vm1564_vm7, 1.0, %v4554_v3  ;;  %vm3527_vm7 = vcmask 7168  }
 0x394   :  { %v978_v62 = vadd.f32 %v977_v61, %v973_v60  ;;  %v1573_v61 = vsub.f32 1.0, %v3594_v59 }
 0x395   :  { %v997_v0 = vpop.permute.xlu0 %996 }
 0x396   :  { %v987_v63 = vmul.f32 %v985_v54, %v978_v62 }
 0x398   :  { %v999_v1 = vadd.f32 %v997_v0, %v987_v63 }
 0x39a   :  { %1001 = vrot.lane.b32.xlu1 %v999_v1, %s4559_s9 }
 0x39e   :  { %1179 = vperm.xlu1 %4444, %v3586_v49  }
 0x3a6   :  { %v1187_v21 = vpop.permute.xlu0 %1186 }
 0x40c   :  { %v1002_v2 = vpop.permute.xlu1 %1001 }
 0x40d   :  { %1004 = vst.msk [vmem:[#allocation2] sm:$0xff] %vm80_vm0, %v1002_v2 }
 0x414   :  { %v1005_v4 = vld [vmem:[#allocation2] sm:$0xff] }
 0x415   :  { %1169 = vrot.lane.b32.xlu1 %v1005_v4, %s4558_s6  ;;  %3953 = vmatmul.mubr.msk.f32.vlgmr.msra.gmra.mrb[14].mxu0 %vm80_vm0, %v1005_v4  ;;  %v1189_v23 = vmul.f32 %v1187_v21, %v1005_v4 }
 0x416   :  { %3964 = vmatmul.mubr.msk.f32.vlgmr.msra.gmra.mrb[22].mxu1 %vm80_vm0, %v1005_v4  ;;  %4295 = vmatpush3.bf16.msra.mxu0 %v4771_v38 }
 0x417   :  { %4301 = vmatpush3.bf16.msra.mxu1 %v4840_v53  ;;  %4296 = vmatprep.subr.bf16.mxu0 %v4556_v41 }
 0x418   :  { %4302 = vmatprep.subr.bf16.mxu1 %v4556_v41  ;;  %3974 = vmatprep.mubr.msk.f32.mxu0 %vm4557_vm2, %v4554_v3 }
 0x419   :  { %3985 = vmatprep.mubr.msk.f32.mxu1 %vm4557_vm2, %v4554_v3 }
 0x41a   :  { %4298 = vmatpush3.bf16.msra.mxu0 %v4797_v47 }
 0x41b   :  { %4304 = vmatpush3.bf16.msra.mxu1 %v4853_v56  ;;  %4305 = vmatprep.subr.bf16.mxu0 %v4556_v41 }
 0x41c   :  { %4311 = vmatprep.subr.bf16.mxu1 %v4556_v41 }
 0x41d   :  { %v1180_v25 = vpop.permute.xlu1 %1179 }
 0x487   :  { %v1170_v27 = vpop.permute.xlu1 %1169 }
 0x4e8   :  { %v1075_v5 = vpop.f32.mrb[14].mxu0 }
 0x4e9   :  { %v1151_v7 = vadd.f32 %v1150_v6, %v1075_v5  ;;  %v1145_v8 = vpop.f32.mrb[22].mxu1  ;;  %v3954_v9 = vpop.f32.mrb[15].mxu0 }
 0x4ea   :  { %v3965_v10 = vpop.f32.mrb[23].mxu1  ;;  %v1146_v15 = vadd.f32 %v4921_v12, %v1145_v8 }
 0x4eb   :  { %v3585_v11 = vmul.f32 -1.442695, %v1151_v7 }
 0x4ed   :  { %4457 = vpow2.f32 %v3585_v11 }
 0x4f7   :  { %v4458_v13 = vpop.eup %4457 }
 0x4f8   :  { %v1155_v14 = vadd.f32 1.0, %v4458_v13  ;;  %v1540_v13 = vld [vmem:[#allocation3 + $0x20] sm:$0xff] }
 0x4fa   :  { %4459 = vrcp.f32 %v1155_v14 }
 0x504   :  { %v4460_v16 = vpop.eup %4459 }
 0x505   :  { %v1160_v17 = vmul.f32 %v4460_v16, %v1146_v15  ;;  %v1163_v26 = vsub.f32 1.0, %v4460_v16  ;;  %v1172_v31 = vmul.f32 %v4460_v16, %v1170_v27 }
 0x507   :  { %v1161_v19 = vadd.f32 %v1160_v17, %v1159_v18 }
 0x509   :  { %4461 = vtanh.f32 %v1161_v19 }
 0x513   :  { %v4462_v20 = vpop.eup %4461 }
 0x514   :  { %1165 = vrot.lane.b32.xlu0 %v4462_v20, %s4558_s6 }
 0x518   :  { %1191 = vrot.lane.b32.xlu0 %v1189_v23, %s4558_s6 }
 0x51c   :  { %1381 = vperm.xlu0 %4443, %v1378_v24   ;;  %v1549_v24 = vld [vmem:[#allocation4 + $0x20] sm:$0xff] }
 0x586   :  { %v1166_v29 = vpop.permute.xlu0 %1165 }
 0x587   :  { %v1168_v30 = vmul.f32 %v1166_v29, %v1163_v26  ;;  %v3598_v29 = vsel %vm1759_vm8, 1.0, %v4554_v3 }
 0x589   :  { %v1173_v50 = vadd.f32 %v1172_v31, %v1168_v30  ;;  %v1768_v31 = vsub.f32 1.0, %v3598_v29 }
 0x58a   :  { %v1192_v32 = vpop.permute.xlu0 %1191 }
 0x58b   :  { %v1182_v58 = vmul.f32 %v1180_v25, %v1173_v50 }
 0x58d   :  { %v1194_v33 = vadd.f32 %v1192_v32, %v1182_v58 }
 0x58f   :  { %1196 = vrot.lane.b32.xlu1 %v1194_v33, %s4559_s9 }
 0x593   :  { %1374 = vperm.xlu1 %4444, %v3590_v22  }
 0x59b   :  { %v1382_v57 = vpop.permute.xlu0 %1381 }
 0x601   :  { %v1197_v34 = vpop.permute.xlu1 %1196 }
 0x602   :  { %1199 = vst.msk [vmem:[#allocation2] sm:$0xff] %vm80_vm0, %v1197_v34 }
 0x609   :  { %v1200_v35 = vld [vmem:[#allocation2] sm:$0xff] }
 0x60a   :  { %1364 = vrot.lane.b32.xlu1 %v1200_v35, %s4558_s6  ;;  %3975 = vmatmul.mubr.msk.f32.vlgmr.msra.gmra.mrb[16].mxu0 %vm80_vm0, %v1200_v35  ;;  %v1384_v60 = vmul.f32 %v1382_v57, %v1200_v35 }
 0x60b   :  { %3986 = vmatmul.mubr.msk.f32.vlgmr.msra.gmra.mrb[24].mxu1 %vm80_vm0, %v1200_v35  ;;  %4307 = vmatpush3.bf16.msra.mxu0 %v4771_v38 }
 0x60c   :  { %4313 = vmatpush3.bf16.msra.mxu1 %v4840_v53  ;;  %4308 = vmatprep.subr.bf16.mxu0 %v4556_v41 }
 0x60d   :  { %4314 = vmatprep.subr.bf16.mxu1 %v4556_v41  ;;  %3996 = vmatprep.mubr.msk.f32.mxu0 %vm4557_vm2, %v4554_v3 }
 0x60e   :  { %4007 = vmatprep.mubr.msk.f32.mxu1 %vm4557_vm2, %v4554_v3 }
 0x60f   :  { %4310 = vmatpush3.bf16.msra.mxu0 %v4797_v47 }
 0x610   :  { %4316 = vmatpush3.bf16.msra.mxu1 %v4853_v56  ;;  %4317 = vmatprep.subr.bf16.mxu0 %v4556_v41 }
 0x611   :  { %4323 = vmatprep.subr.bf16.mxu1 %v4556_v41 }
 0x612   :  { %v1375_v62 = vpop.permute.xlu1 %1374 }
 0x67c   :  { %v1365_v0 = vpop.permute.xlu1 %1364 }
 0x6dd   :  { %v1270_v36 = vpop.f32.mrb[16].mxu0 }
 0x6de   :  { %v1346_v39 = vadd.f32 %v1345_v37, %v1270_v36  ;;  %v1340_v40 = vpop.f32.mrb[24].mxu1  ;;  %v3976_v42 = vpop.f32.mrb[17].mxu0 }
 0x6df   :  { %v3987_v43 = vpop.f32.mrb[25].mxu1  ;;  %v1341_v48 = vadd.f32 %v4921_v12, %v1340_v40 }
 0x6e0   :  { %v3589_v44 = vmul.f32 -1.442695, %v1346_v39 }
 0x6e2   :  { %4463 = vpow2.f32 %v3589_v44 }
 0x6ec   :  { %v4464_v45 = vpop.eup %4463 }
 0x6ed   :  { %v1350_v46 = vadd.f32 1.0, %v4464_v45  ;;  %v1735_v45 = vld [vmem:[#allocation3 + $0x28] sm:$0xff] }
 0x6ef   :  { %4465 = vrcp.f32 %v1350_v46 }
 0x6f9   :  { %v4466_v49 = vpop.eup %4465 }
 0x6fa   :  { %v1355_v51 = vmul.f32 %v4466_v49, %v1341_v48  ;;  %v1358_v63 = vsub.f32 1.0, %v4466_v49  ;;  %v1367_v4 = vmul.f32 %v4466_v49, %v1365_v0 }
 0x6fc   :  { %v1356_v54 = vadd.f32 %v1355_v51, %v1354_v52 }
 0x6fe   :  { %4467 = vtanh.f32 %v1356_v54 }
 0x708   :  { %v4468_v55 = vpop.eup %4467 }
 0x709   :  { %1360 = vrot.lane.b32.xlu0 %v4468_v55, %s4558_s6 }
 0x70d   :  { %1386 = vrot.lane.b32.xlu0 %v1384_v60, %s4558_s6 }
 0x711   :  { %1576 = vperm.xlu0 %4443, %v1573_v61   ;;  %v1744_v61 = vld [vmem:[#allocation4 + $0x28] sm:$0xff] }
 0x77b   :  { %v1361_v1 = vpop.permute.xlu0 %1360 }
 0x77c   :  { %v1363_v2 = vmul.f32 %v1361_v1, %v1358_v63  ;;  %v3602_v1 = vsel %vm1954_vm9, 1.0, %v4554_v3 }
 0x77e   :  { %v1368_v5 = vadd.f32 %v1367_v4, %v1363_v2  ;;  %v1963_v4 = vsub.f32 1.0, %v3602_v1 }
 0x77f   :  { %v1387_v7 = vpop.permute.xlu0 %1386 }
 0x780   :  { %v1377_v6 = vmul.f32 %v1375_v62, %v1368_v5 }
 0x782   :  { %v1389_v8 = vadd.f32 %v1387_v7, %v1377_v6 }
 0x784   :  { %1391 = vrot.lane.b32.xlu1 %v1389_v8, %s4559_s9 }
 0x788   :  { %1569 = vperm.xlu1 %4444, %v3594_v59  }
 0x790   :  { %v1577_v27 = vpop.permute.xlu0 %1576 }
 0x7f6   :  { %v1392_v9 = vpop.permute.xlu1 %1391 }
 0x7f7   :  { %1394 = vst.msk [vmem:[#allocation2] sm:$0xff] %vm80_vm0, %v1392_v9 }
 0x7fe   :  { %v1395_v10 = vld [vmem:[#allocation2] sm:$0xff] }
 0x7ff   :  { %1559 = vrot.lane.b32.xlu1 %v1395_v10, %s4558_s6  ;;  %3997 = vmatmul.mubr.msk.f32.vlgmr.msra.gmra.mrb[18].mxu0 %vm80_vm0, %v1395_v10  ;;  %v1579_v30 = vmul.f32 %v1577_v27, %v1395_v10  ;;  %v4553_v27 = vld [vmem:[%s5406_s2] sm:$0xff] }
 0x800   :  { %4008 = vmatmul.mubr.msk.f32.vlgmr.msra.gmra.mrb[26].mxu1 %vm80_vm0, %v1395_v10  ;;  %4319 = vmatpush3.bf16.msra.mxu0 %v4771_v38  ;;  %vm2149_vm10 = vcmp.gt.s32.totalorder %v4553_v27, 7 }
 0x801   :  { %4325 = vmatpush3.bf16.msra.mxu1 %v4840_v53  ;;  %4320 = vmatprep.subr.bf16.mxu0 %v4556_v41 }
 0x802   :  { %4326 = vmatprep.subr.bf16.mxu1 %v4556_v41  ;;  %4018 = vmatprep.mubr.msk.f32.mxu0 %vm4557_vm2, %v4554_v3 }
 0x803   :  { %4029 = vmatprep.mubr.msk.f32.mxu1 %vm4557_vm2, %v4554_v3 }
 0x804   :  { %4322 = vmatpush3.bf16.msra.mxu0 %v4797_v47 }
 0x805   :  { %4328 = vmatpush3.bf16.msra.mxu1 %v4853_v56  ;;  %4329 = vmatprep.subr.bf16.mxu0 %v4556_v41 }
 0x806   :  { %4335 = vmatprep.subr.bf16.mxu1 %v4556_v41 }
 0x807   :  { %v1570_v50 = vpop.permute.xlu1 %1569 }
 0x871   :  { %v1560_v32 = vpop.permute.xlu1 %1559 }
 0x8d2   :  { %v1465_v11 = vpop.f32.mrb[18].mxu0 }
 0x8d3   :  { %v1541_v14 = vadd.f32 %v1540_v13, %v1465_v11  ;;  %v1535_v15 = vpop.f32.mrb[26].mxu1  ;;  %v3998_v16 = vpop.f32.mrb[19].mxu0 }
 0x8d4   :  { %v4009_v17 = vpop.f32.mrb[27].mxu1  ;;  %v1536_v21 = vadd.f32 %v4921_v12, %v1535_v15 }
 0x8d5   :  { %v3593_v18 = vmul.f32 -1.442695, %v1541_v14 }
 0x8d7   :  { %4469 = vpow2.f32 %v3593_v18 }
 0x8e1   :  { %v4470_v19 = vpop.eup %4469 }
 0x8e2   :  { %v1545_v20 = vadd.f32 1.0, %v4470_v19 }
 0x8e4   :  { %4471 = vrcp.f32 %v1545_v20 }
 0x8ee   :  { %v4472_v22 = vpop.eup %4471 }
 0x8ef   :  { %v1550_v23 = vmul.f32 %v4472_v22, %v1536_v21  ;;  %v1553_v58 = vsub.f32 1.0, %v4472_v22  ;;  %v1562_v35 = vmul.f32 %v4472_v22, %v1560_v32 }
 0x8f1   :  { %v1551_v25 = vadd.f32 %v1550_v23, %v1549_v24 }
 0x8f3   :  { %4473 = vtanh.f32 %v1551_v25 }
 0x8fd   :  { %v4474_v26 = vpop.eup %4473 }
 0x8fe   :  { %1555 = vrot.lane.b32.xlu0 %v4474_v26, %s4558_s6 }
 0x902   :  { %1581 = vrot.lane.b32.xlu0 %v1579_v30, %s4558_s6 }
 0x906   :  { %1771 = vperm.xlu0 %4443, %v1768_v31   ;;  %v3606_v31 = vsel %vm2149_vm10, 1.0, %v4554_v3 }
 0x970   :  { %v1556_v33 = vpop.permute.xlu0 %1555 }
 0x971   :  { %v1558_v34 = vmul.f32 %v1556_v33, %v1553_v58  ;;  %v2158_v58 = vsub.f32 1.0, %v3606_v31 }
 0x973   :  { %v1563_v36 = vadd.f32 %v1562_v35, %v1558_v34 }
 0x974   :  { %v1582_v39 = vpop.permute.xlu0 %1581 }
 0x975   :  { %v1572_v37 = vmul.f32 %v1570_v50, %v1563_v36 }
 0x977   :  { %v1584_v40 = vadd.f32 %v1582_v39, %v1572_v37 }
 0x979   :  { %1586 = vrot.lane.b32.xlu1 %v1584_v40, %s4559_s9 }
 0x97d   :  { %1764 = vperm.xlu1 %4444, %v3598_v29  }
 0x985   :  { %v1772_v0 = vpop.permute.xlu0 %1771 }
 0x9eb   :  { %v1587_v42 = vpop.permute.xlu1 %1586 }
 0x9ec   :  { %1589 = vst.msk [vmem:[#allocation2] sm:$0xff] %vm80_vm0, %v1587_v42 }
 0x9f3   :  { %v1590_v43 = vld [vmem:[#allocation2] sm:$0xff] }
 0x9f4   :  { %1754 = vrot.lane.b32.xlu1 %v1590_v43, %s4558_s6  ;;  %4019 = vmatmul.mubr.msk.f32.vlgmr.msra.gmra.mrb[20].mxu0 %vm80_vm0, %v1590_v43  ;;  %v1774_v2 = vmul.f32 %v1772_v0, %v1590_v43 }
 0x9f5   :  { %4030 = vmatmul.mubr.msk.f32.vlgmr.msra.gmra.mrb[28].mxu1 %vm80_vm0, %v1590_v43  ;;  %4331 = vmatpush3.bf16.msra.mxu0 %v4771_v38 }
 0x9f6   :  { %4337 = vmatpush3.bf16.msra.mxu1 %v4840_v53  ;;  %4332 = vmatprep.subr.bf16.mxu0 %v4556_v41 }
 0x9f7   :  { %4338 = vmatprep.subr.bf16.mxu1 %v4556_v41  ;;  %4040 = vmatprep.mubr.msk.f32.mxu0 %vm4557_vm2, %v4554_v3 }
 0x9f8   :  { %4051 = vmatprep.mubr.msk.f32.mxu1 %vm4557_vm2, %v4554_v3 }
 0x9f9   :  { %4334 = vmatpush3.bf16.msra.mxu0 %v4797_v47 }
 0x9fa   :  { %4340 = vmatpush3.bf16.msra.mxu1 %v4853_v56  ;;  %4341 = vmatprep.subr.bf16.mxu0 %v4556_v41 }
 0x9fb   :  { %4347 = vmatprep.subr.bf16.mxu1 %v4556_v41 }
 0x9fc   :  { %v1765_v5 = vpop.permute.xlu1 %1764 }
 0xa66   :  { %v1755_v7 = vpop.permute.xlu1 %1754 }
 0xac7   :  { %v1660_v44 = vpop.f32.mrb[20].mxu0 }
 0xac8   :  { %v1736_v46 = vadd.f32 %v1735_v45, %v1660_v44  ;;  %v1730_v48 = vpop.f32.mrb[28].mxu1  ;;  %v4020_v49 = vpop.f32.mrb[21].mxu0 }
 0xac9   :  { %v4031_v51 = vpop.f32.mrb[29].mxu1  ;;  %v1731_v57 = vadd.f32 %v4921_v12, %v1730_v48  ;;  %v2125_v48 = vld [vmem:[#allocation3 + $0x38] sm:$0xff] }
 0xaca   :  { %v3597_v52 = vmul.f32 -1.442695, %v1736_v46 }
 0xacc   :  { %4475 = vpow2.f32 %v3597_v52 }
 0xad6   :  { %v4476_v54 = vpop.eup %4475 }
 0xad7   :  { %v1740_v55 = vadd.f32 1.0, %v4476_v54 }
 0xad9   :  { %4477 = vrcp.f32 %v1740_v55 }
 0xae3   :  { %v4478_v59 = vpop.eup %4477 }
 0xae4   :  { %v1745_v60 = vmul.f32 %v4478_v59, %v1731_v57  ;;  %v1748_v6 = vsub.f32 1.0, %v4478_v59  ;;  %v1757_v10 = vmul.f32 %v4478_v59, %v1755_v7 }
 0xae6   :  { %v1746_v62 = vadd.f32 %v1745_v60, %v1744_v61 }
 0xae8   :  { %4479 = vtanh.f32 %v1746_v62 }
 0xaf2   :  { %v4480_v63 = vpop.eup %4479 }
 0xaf3   :  { %1750 = vrot.lane.b32.xlu0 %v4480_v63, %s4558_s6  ;;  %v2134_v63 = vld [vmem:[#allocation4 + $0x38] sm:$0xff] }
 0xaf7   :  { %1776 = vrot.lane.b32.xlu0 %v1774_v2, %s4558_s6 }
 0xafb   :  { %1966 = vperm.xlu0 %4443, %v1963_v4  }
 0xb65   :  { %v1751_v8 = vpop.permute.xlu0 %1750 }
 0xb66   :  { %v1753_v9 = vmul.f32 %v1751_v8, %v1748_v6  ;;  %v605_v6 = vld [vmem:[%s5416_s13] sm:$0xff] }
 0xb68   :  { %v1758_v11 = vadd.f32 %v1757_v10, %v1753_v9  ;;  %v606_v9 = vld [vmem:[%s5416_s13 + $0x8] sm:$0xff]  ;;  %v603_v10 = vld [vmem:[%s5415_s12 + $0x10] sm:$0xff] }
 0xb69   :  { %v1777_v28 = vpop.permute.xlu0 %1776 }
 0xb6a   :  { %v1767_v13 = vmul.f32 %v1765_v5, %v1758_v11  ;;  %v601_v5 = vld [vmem:[%s5415_s12] sm:$0xff]  ;;  %v604_v11 = vld [vmem:[%s5415_s12 + $0x18] sm:$0xff] }
 0xb6c   :  { %v1779_v14 = vadd.f32 %v1777_v28, %v1767_v13  ;;  %v5094_v13 = vpack.c.bf16 %v606_v9, %v605_v6  ;;  %v607_v28 = vld [vmem:[%s5416_s13 + $0x10] sm:$0xff] }
 0xb6e   :  { %1781 = vrot.lane.b32.xlu1 %v1779_v14, %s4559_s9  ;;  %v608_v14 = vld [vmem:[%s5416_s13 + $0x18] sm:$0xff] }
 0xb72   :  { %1959 = vperm.xlu1 %4444, %v3602_v1  }
 0xb7a   :  { %v1967_v30 = vpop.permute.xlu0 %1966 }
 0xbe0   :  { %v1782_v15 = vpop.permute.xlu1 %1781 }
 0xbe1   :  { %1784 = vst.msk [vmem:[#allocation2] sm:$0xff] %vm80_vm0, %v1782_v15  ;;  %v5103_v15 = vpack.c.bf16 %v604_v11, %v603_v10 }
 0xbe8   :  { %v1785_v16 = vld [vmem:[#allocation2] sm:$0xff] }
 0xbe9   :  { %1949 = vrot.lane.b32.xlu1 %v1785_v16, %s4558_s6  ;;  %4041 = vmatmul.mubr.msk.f32.vlgmr.msra.gmra.mrb[22].mxu0 %vm80_vm0, %v1785_v16  ;;  %v1969_v50 = vmul.f32 %v1967_v30, %v1785_v16 }
 0xbea   :  { %4052 = vmatmul.mubr.msk.f32.vlgmr.msra.gmra.mrb[30].mxu1 %vm80_vm0, %v1785_v16  ;;  %4343 = vmatpush3.bf16.msra.mxu0 %v4771_v38 }
 0xbeb   :  { %4349 = vmatpush3.bf16.msra.mxu1 %v4840_v53  ;;  %4344 = vmatprep.subr.bf16.mxu0 %v4556_v41  ;;  %v1930_v53 = vld [vmem:[#allocation3 + $0x30] sm:$0xff] }
 0xbec   :  { %4350 = vmatprep.subr.bf16.mxu1 %v4556_v41  ;;  %4062 = vmatprep.mubr.msk.f32.mxu0 %vm4557_vm2, %v4554_v3 }
 0xbed   :  { %4073 = vmatprep.mubr.msk.f32.mxu1 %vm4557_vm2, %v4554_v3 }
 0xbee   :  { %4346 = vmatpush3.bf16.msra.mxu0 %v4797_v47 }
 0xbef   :  { %4352 = vmatpush3.bf16.msra.mxu1 %v4853_v56  ;;  %4353 = vmatprep.subr.bf16.mxu0 %v4556_v41  ;;  %v1939_v56 = vld [vmem:[#allocation4 + $0x30] sm:$0xff] }
 0xbf0   :  { %4359 = vmatprep.subr.bf16.mxu1 %v4556_v41 }
 0xbf1   :  { %v1960_v32 = vpop.permute.xlu1 %1959 }
 0xc5b   :  { %v1950_v34 = vpop.permute.xlu1 %1949 }
 0xcbc   :  { %v1855_v38 = vpop.f32.mrb[22].mxu0 }
 0xcbd   :  { %v1931_v17 = vadd.f32 %v1930_v53, %v1855_v38  ;;  %v1925_v18 = vpop.f32.mrb[30].mxu1  ;;  %v4042_v19 = vpop.f32.mrb[23].mxu0  ;;  %v5107_v38 = vpack.c.bf16 %v608_v14, %v607_v28 }
 0xcbe   :  { %v4053_v20 = vpop.f32.mrb[31].mxu1  ;;  %v1926_v24 = vadd.f32 %v4921_v12, %v1925_v18 }
 0xcbf   :  { %v3601_v21 = vmul.f32 -1.442695, %v1931_v17 }
 0xcc1   :  { %4481 = vpow2.f32 %v3601_v21 }
 0xccb   :  { %v4482_v22 = vpop.eup %4481 }
 0xccc   :  { %v1935_v23 = vadd.f32 1.0, %v4482_v22 }
 0xcce   :  { %4483 = vrcp.f32 %v1935_v23 }
 0xcd8   :  { %v4484_v47 = vpop.eup %4483 }
 0xcd9   :  { %v1940_v25 = vmul.f32 %v4484_v47, %v1926_v24  ;;  %v1943_v33 = vsub.f32 1.0, %v4484_v47  ;;  %v1952_v37 = vmul.f32 %v4484_v47, %v1950_v34 }
 0xcdb   :  { %v1941_v26 = vadd.f32 %v1940_v25, %v1939_v56  ;;  %v2325_v56 = vld [vmem:[#allocation5] sm:$0xff] }
 0xcdd   :  { %4485 = vtanh.f32 %v1941_v26 }
 0xce7   :  { %v4486_v29 = vpop.eup %4485 }
 0xce8   :  { %1945 = vrot.lane.b32.xlu0 %v4486_v29, %s4558_s6 }
 0xcec   :  { %1971 = vrot.lane.b32.xlu0 %v1969_v50, %s4558_s6 }
 0xcf0   :  { %2161 = vperm.xlu0 %4443, %v2158_v58  }
 0xd5a   :  { %v1946_v35 = vpop.permute.xlu0 %1945 }
 0xd5b   :  { %v1948_v36 = vmul.f32 %v1946_v35, %v1943_v33 }
 0xd5d   :  { %v1953_v39 = vadd.f32 %v1952_v37, %v1948_v36  ;;  %v2333_v36 = vld [vmem:[#allocation6] sm:$0xff] }
 0xd5e   :  { %v1972_v42 = vpop.permute.xlu0 %1971 }
 0xd5f   :  { %v1962_v40 = vmul.f32 %v1960_v32, %v1953_v39  ;;  %v5134_v32 = vld [vmem:[%s5417_s16] ss:$0 sm:$0xff] }
 0xd61   :  { %v1974_v43 = vadd.f32 %v1972_v42, %v1962_v40 }
 0xd63   :  { %1976 = vrot.lane.b32.xlu1 %v1974_v43, %s4559_s9 }
 0xd67   :  { %2154 = vperm.xlu1 %4444, %v3606_v31  }
 0xd6f   :  { %v2162_v2 = vpop.permute.xlu0 %2161 }
 0xdd5   :  { %v1977_v44 = vpop.permute.xlu1 %1976 }
 0xdd6   :  { %1979 = vst.msk [vmem:[#allocation2] sm:$0xff] %vm80_vm0, %v1977_v44 }
 0xddd   :  { %v1980_v45 = vld [vmem:[#allocation2] sm:$0xff] }
 0xdde   :  { %2144 = vrot.lane.b32.xlu1 %v1980_v45, %s4558_s6  ;;  %4063 = vmatmul.mubr.msk.f32.vlgmr.msra.gmra.mrb[24].mxu0 %vm80_vm0, %v1980_v45  ;;  %v2164_v4 = vmul.f32 %v2162_v2, %v1980_v45  ;;  %v2508_v2 = vld [vmem:[#allocation6 + $0x8] sm:$0xff] }
 0xddf   :  { %4074 = vmatmul.mubr.msk.f32.vlgmr.msra.gmra.mrb[32].mxu1 %vm80_vm0, %v1980_v45  ;;  %4084 = vmatprep.mubr.msk.f32.mxu0 %vm4557_vm2, %v4554_v3 }
 0xde0   :  { %4095 = vmatprep.mubr.msk.f32.mxu1 %vm4557_vm2, %v4554_v3  ;;  %4361 = vmatpush3.bf16.msra.mxu1 %v5094_v13 }
 0xde1   :  { %4362 = vmatprep.subr.bf16.mxu1 %v4556_v41 }
 0xde4   :  { %4364 = vmatpush3.bf16.msra.mxu1 %v5107_v38 }
 0xde5   :  { %4371 = vmatprep.subr.bf16.mxu1 %v4556_v41 }
 0xde6   :  { %v2155_v7 = vpop.permute.xlu1 %2154 }
 0xe50   :  { %v2145_v53 = vpop.permute.xlu1 %2144 }
 0xeb1   :  { %v2050_v46 = vpop.f32.mrb[24].mxu0 }
 0xeb2   :  { %v2126_v49 = vadd.f32 %v2125_v48, %v2050_v46  ;;  %v2120_v51 = vpop.f32.mrb[32].mxu1  ;;  %v4064_v52 = vpop.f32.mrb[25].mxu0 }
 0xeb3   :  { %v4075_v54 = vpop.f32.mrb[33].mxu1  ;;  %v2121_v60 = vadd.f32 %v4921_v12, %v2120_v51  ;;  %v602_v12 = vld [vmem:[%s5415_s12 + $0x8] sm:$0xff]  ;;  %v2499_v52 = vld [vmem:[#allocation5 + $0x8] sm:$0xff] }
 0xeb4   :  { %v3605_v55 = vmul.f32 -1.442695, %v2126_v49  ;;  %v5083_v8 = vpack.c.bf16 %v602_v12, %v601_v5 }
 0xeb6   :  { %4487 = vpow2.f32 %v3605_v55  ;;  %4355 = vmatpush3.bf16.msra.mxu0 %v5083_v8 }
 0xeb7   :  { %4356 = vmatprep.subr.bf16.mxu0 %v4556_v41 }
 0xeba   :  { %4358 = vmatpush3.bf16.msra.mxu0 %v5103_v15 }
 0xebb   :  { %4365 = vmatprep.subr.bf16.mxu0 %v4556_v41 }
 0xec0   :  { %v4488_v57 = vpop.eup %4487 }
 0xec1   :  { %v2130_v59 = vadd.f32 1.0, %v4488_v57 }
 0xec3   :  { %4489 = vrcp.f32 %v2130_v59 }
 0xecd   :  { %v4490_v61 = vpop.eup %4489 }
 0xece   :  { %v2135_v62 = vmul.f32 %v4490_v61, %v2121_v60  ;;  %v2138_v16 = vsub.f32 1.0, %v4490_v61  ;;  %v2147_v19 = vmul.f32 %v4490_v61, %v2145_v53  ;;  %v2675_v53 = vld [vmem:[#allocation5 + $0x10] sm:$0xff] }
 0xed0   :  { %v2136_v0 = vadd.f32 %v2135_v62, %v2134_v63 }
 0xed2   :  { %4491 = vtanh.f32 %v2136_v0 }
 0xedc   :  { %v4492_v1 = vpop.eup %4491 }
 0xedd   :  { %2140 = vrot.lane.b32.xlu0 %v4492_v1, %s4558_s6 }
 0xee1   :  { %2166 = vrot.lane.b32.xlu0 %v2164_v4, %s4558_s6 }
 0xf4f   :  { %v2141_v17 = vpop.permute.xlu0 %2140 }
 0xf50   :  { %v2143_v18 = vmul.f32 %v2141_v17, %v2138_v16 }
 0xf52   :  { %v2148_v20 = vadd.f32 %v2147_v19, %v2143_v18 }
 0xf53   :  { %v2167_v22 = vpop.permute.xlu0 %2166 }
 0xf54   :  { %v2157_v21 = vmul.f32 %v2155_v7, %v2148_v20 }
 0xf56   :  { %v2169_v23 = vadd.f32 %v2167_v22, %v2157_v21 }
 0xf58   :  { %2171 = vrot.lane.b32.xlu1 %v2169_v23, %s4559_s9 }
 0xfca   :  { %v2172_v24 = vpop.permute.xlu1 %2171 }
 0xfcb   :  { %2174 = vst.msk [vmem:[#allocation2] sm:$0xff] %vm80_vm0, %v2172_v24 }
 0xfd2   :  { %v2175_v47 = vld [vmem:[#allocation2] sm:$0xff] }
 0xfd3   :  { %2343 = vrot.lane.b32.xlu1 %v2175_v47, %s4558_s6  ;;  %4085 = vmatmul.mubr.msk.f32.vlgmr.msra.gmra.mrb[26].mxu0 %vm80_vm0, %v2175_v47 }
 0xfd4   :  { %4096 = vmatmul.mubr.msk.f32.vlgmr.msra.gmra.mrb[34].mxu1 %vm80_vm0, %v2175_v47  ;;  %4367 = vmatpush3.bf16.msra.mxu0 %v5083_v8 }
 0xfd5   :  { %4373 = vmatpush3.bf16.msra.mxu1 %v5094_v13  ;;  %4368 = vmatprep.subr.bf16.mxu0 %v4556_v41 }
 0xfd6   :  { %4374 = vmatprep.subr.bf16.mxu1 %v4556_v41  ;;  %4106 = vmatprep.mubr.msk.f32.mxu0 %vm4557_vm2, %v4554_v3 }
 0xfd7   :  { %4117 = vmatprep.mubr.msk.f32.mxu1 %vm4557_vm2, %v4554_v3 }
 0xfd8   :  { %4370 = vmatpush3.bf16.msra.mxu0 %v5103_v15 }
 0xfd9   :  { %4376 = vmatpush3.bf16.msra.mxu1 %v5107_v38  ;;  %4377 = vmatprep.subr.bf16.mxu0 %v4556_v41 }
 0xfda   :  { %4383 = vmatprep.subr.bf16.mxu1 %v4556_v41 }
0x1045   :  { %v2344_v42 = vpop.permute.xlu1 %2343 }
0x10a6   :  { %v2245_v25 = vpop.f32.mrb[26].mxu0 }
0x10a7   :  { %v2326_v26 = vadd.f32 %v2325_v56, %v2245_v25  ;;  %v2321_v27 = vpop.f32.mrb[34].mxu1  ;;  %v4086_v29 = vpop.f32.mrb[27].mxu0  ;;  %v2684_v56 = vld [vmem:[#allocation6 + $0x10] sm:$0xff] }
0x10a8   :  { %v4097_v30 = vpop.f32.mrb[35].mxu1  ;;  %v2322_v33 = vadd.f32 %v5134_v32, %v2321_v27 }
0x10a9   :  { %v3610_v31 = vmul.f32 -1.442695, %v2326_v26 }
0x10ab   :  { %4493 = vpow2.f32 %v3610_v31 }
0x10b5   :  { %v4494_v50 = vpop.eup %4493 }
0x10b6   :  { %v2330_v58 = vadd.f32 1.0, %v4494_v50 }
0x10b8   :  { %4495 = vrcp.f32 %v2330_v58 }
0x10c2   :  { %v4496_v34 = vpop.eup %4495 }
0x10c3   :  { %v2334_v35 = vmul.f32 %v4496_v34, %v2322_v33  ;;  %v2337_v40 = vsub.f32 1.0, %v4496_v34  ;;  %v2346_v44 = vmul.f32 %v4496_v34, %v2344_v42 }
0x10c5   :  { %v2335_v37 = vadd.f32 %v2334_v35, %v2333_v36 }
0x10c7   :  { %4497 = vtanh.f32 %v2335_v37  ;;  %v2851_v37 = vld [vmem:[#allocation5 + $0x18] sm:$0xff] }
0x10d1   :  { %v4498_v39 = vpop.eup %4497 }
0x10d2   :  { %2339 = vrot.lane.b32.xlu0 %v4498_v39, %s4558_s6 }
0x1144   :  { %v2340_v43 = vpop.permute.xlu0 %2339 }
0x1145   :  { %v2342_v45 = vmul.f32 %v2340_v43, %v2337_v40 }
0x1147   :  { %v2347_v46 = vadd.f32 %v2346_v44, %v2342_v45 }
0x1149   :  { %2349 = vrot.lane.b32.xlu0 %v2347_v46, %s4559_s9 }
0x11bb   :  { %v2350_v48 = vpop.permute.xlu0 %2349 }
0x11bc   :  { %2352 = vst.msk [vmem:[#allocation2] sm:$0xff] %vm80_vm0, %v2350_v48  ;;  %2353 = vst.msk [vmem:[#allocation7] sm:$0xff] %vm80_vm0, %v2350_v48 }
0x11c3   :  { %v2354_v49 = vld [vmem:[#allocation2] sm:$0xff] }
0x11c4   :  { %2518 = vrot.lane.b32.xlu0 %v2354_v49, %s4558_s6  ;;  %4107 = vmatmul.mubr.msk.f32.vlgmr.msra.gmra.mrb[28].mxu0 %vm80_vm0, %v2354_v49 }
0x11c5   :  { %4118 = vmatmul.mubr.msk.f32.vlgmr.msra.gmra.mrb[36].mxu1 %vm80_vm0, %v2354_v49  ;;  %4379 = vmatpush3.bf16.msra.mxu0 %v5083_v8 }
0x11c6   :  { %4385 = vmatpush3.bf16.msra.mxu1 %v5094_v13  ;;  %4380 = vmatprep.subr.bf16.mxu0 %v4556_v41 }
0x11c7   :  { %4386 = vmatprep.subr.bf16.mxu1 %v4556_v41  ;;  %4128 = vmatprep.mubr.msk.f32.mxu0 %vm4557_vm2, %v4554_v3 }
0x11c8   :  { %4139 = vmatprep.mubr.msk.f32.mxu1 %vm4557_vm2, %v4554_v3 }
0x11c9   :  { %4382 = vmatpush3.bf16.msra.mxu0 %v5103_v15 }
0x11ca   :  { %4388 = vmatpush3.bf16.msra.mxu1 %v5107_v38  ;;  %4389 = vmatprep.subr.bf16.mxu0 %v4556_v41 }
0x11cb   :  { %4395 = vmatprep.subr.bf16.mxu1 %v4556_v41 }
0x1236   :  { %v2519_v6 = vpop.permute.xlu0 %2518 }
0x1297   :  { %v2424_v51 = vpop.f32.mrb[28].mxu0 }
0x1298   :  { %v2500_v54 = vadd.f32 %v2499_v52, %v2424_v51  ;;  %v2494_v55 = vpop.f32.mrb[36].mxu1  ;;  %v4108_v57 = vpop.f32.mrb[29].mxu0  ;;  %v2860_v52 = vld [vmem:[#allocation6 + $0x18] sm:$0xff] }
0x1299   :  { %v4119_v59 = vpop.f32.mrb[37].mxu1  ;;  %v2495_v63 = vadd.f32 %v5134_v32, %v2494_v55 }
0x129a   :  { %v3613_v60 = vmul.f32 -1.442695, %v2500_v54 }
0x129c   :  { %4499 = vpow2.f32 %v3613_v60 }
0x12a6   :  { %v4500_v61 = vpop.eup %4499 }
0x12a7   :  { %v2504_v62 = vadd.f32 1.0, %v4500_v61 }
0x12a9   :  { %4501 = vrcp.f32 %v2504_v62 }
0x12b3   :  { %v4502_v0 = vpop.eup %4501 }
0x12b4   :  { %v2509_v1 = vmul.f32 %v4502_v0, %v2495_v63  ;;  %v2512_v12 = vsub.f32 1.0, %v4502_v0  ;;  %v2521_v9 = vmul.f32 %v4502_v0, %v2519_v6 }
0x12b6   :  { %v2510_v4 = vadd.f32 %v2509_v1, %v2508_v2 }
0x12b8   :  { %4503 = vtanh.f32 %v2510_v4  ;;  %v3027_v4 = vld [vmem:[#allocation5 + $0x20] sm:$0xff] }
0x12c2   :  { %v4504_v5 = vpop.eup %4503 }
0x12c3   :  { %2514 = vrot.lane.b32.xlu1 %v4504_v5, %s4558_s6 }
0x1335   :  { %v2515_v7 = vpop.permute.xlu1 %2514 }
0x1336   :  { %v2517_v10 = vmul.f32 %v2515_v7, %v2512_v12 }
0x1338   :  { %v2522_v11 = vadd.f32 %v2521_v9, %v2517_v10 }
0x133a   :  { %2524 = vrot.lane.b32.xlu1 %v2522_v11, %s4559_s9 }
0x13ac   :  { %v2525_v28 = vpop.permute.xlu1 %2524 }
0x13ad   :  { %2527 = vst.msk [vmem:[#allocation2] sm:$0xff] %vm80_vm0, %v2525_v28  ;;  %2529 = vst.msk [vmem:[#allocation7 + $0x8] sm:$0xff] %vm80_vm0, %v2525_v28 }
0x13b4   :  { %v2530_v14 = vld [vmem:[#allocation2] sm:$0xff] }
0x13b5   :  { %2694 = vrot.lane.b32.xlu1 %v2530_v14, %s4558_s6  ;;  %4129 = vmatmul.mubr.msk.f32.vlgmr.msra.gmra.mrb[30].mxu0 %vm80_vm0, %v2530_v14 }
0x13b6   :  { %4140 = vmatmul.mubr.msk.f32.vlgmr.msra.gmra.mrb[38].mxu1 %vm80_vm0, %v2530_v14  ;;  %4391 = vmatpush3.bf16.msra.mxu0 %v5083_v8  ;;  %v3241_v14 = vld [vmem:[%s5418_s17 + $0x8] sm:$0xff] }
0x13b7   :  { %4397 = vmatpush3.bf16.msra.mxu1 %v5094_v13  ;;  %4392 = vmatprep.subr.bf16.mxu0 %v4556_v41 }
0x13b8   :  { %4398 = vmatprep.subr.bf16.mxu1 %v4556_v41  ;;  %4150 = vmatprep.mubr.msk.f32.mxu0 %vm4557_vm2, %v4554_v3 }
0x13b9   :  { %4161 = vmatprep.mubr.msk.f32.mxu1 %vm4557_vm2, %v4554_v3 }
0x13ba   :  { %4394 = vmatpush3.bf16.msra.mxu0 %v5103_v15 }
0x13bb   :  { %4400 = vmatpush3.bf16.msra.mxu1 %v5107_v38  ;;  %4401 = vmatprep.subr.bf16.mxu0 %v4556_v41 }
0x13bc   :  { %4407 = vmatprep.subr.bf16.mxu1 %v4556_v41 }
0x1427   :  { %v2695_v30 = vpop.permute.xlu1 %2694 }
0x1488   :  { %v2600_v16 = vpop.f32.mrb[30].mxu0 }
0x1489   :  { %v2676_v17 = vadd.f32 %v2675_v53, %v2600_v16  ;;  %v2670_v18 = vpop.f32.mrb[38].mxu1  ;;  %v4130_v19 = vpop.f32.mrb[31].mxu0 }
0x148a   :  { %v4141_v20 = vpop.f32.mrb[39].mxu1  ;;  %v2671_v24 = vadd.f32 %v5134_v32, %v2670_v18 }
0x148b   :  { %v3616_v21 = vmul.f32 -1.442695, %v2676_v17 }
0x148d   :  { %4505 = vpow2.f32 %v3616_v21 }
0x1497   :  { %v4506_v22 = vpop.eup %4505 }
0x1498   :  { %v2680_v23 = vadd.f32 1.0, %v4506_v22 }
0x149a   :  { %4507 = vrcp.f32 %v2680_v23  ;;  %v3242_v23 = vld [vmem:[%s5418_s17 + $0x10] sm:$0xff] }
0x14a4   :  { %v4508_v47 = vpop.eup %4507 }
0x14a5   :  { %v2685_v25 = vmul.f32 %v4508_v47, %v2671_v24  ;;  %v2688_v29 = vsub.f32 1.0, %v4508_v47  ;;  %v2697_v50 = vmul.f32 %v4508_v47, %v2695_v30  ;;  %v3243_v24 = vld [vmem:[%s5418_s17 + $0x18] sm:$0xff] }
0x14a6   :  { %v4429_v47 = vpack.c.bf16 %v3243_v24, %v3242_v23 }
0x14a7   :  { %v2686_v26 = vadd.f32 %v2685_v25, %v2684_v56  ;;  %v3234_v56 = vld [vmem:[#allocation7] sm:$0xff] }
0x14a9   :  { %4509 = vtanh.f32 %v2686_v26  ;;  %v3235_v26 = vld [vmem:[#allocation7 + $0x8] sm:$0xff] }
0x14b3   :  { %v4510_v27 = vpop.eup %4509 }
0x14b4   :  { %2690 = vrot.lane.b32.xlu0 %v4510_v27, %s4558_s6 }
0x1526   :  { %v2691_v31 = vpop.permute.xlu0 %2690 }
0x1527   :  { %v2693_v58 = vmul.f32 %v2691_v31, %v2688_v29 }
0x1529   :  { %v2698_v33 = vadd.f32 %v2697_v50, %v2693_v58  ;;  %v3203_v50 = vld [vmem:[#allocation5 + $0x28] sm:$0xff] }
0x152b   :  { %2700 = vrot.lane.b32.xlu0 %v2698_v33, %s4559_s9 }
0x159d   :  { %v2701_v34 = vpop.permute.xlu0 %2700 }
0x159e   :  { %2703 = vst.msk [vmem:[#allocation2] sm:$0xff] %vm80_vm0, %v2701_v34  ;;  %2705 = vst.msk [vmem:[#allocation7 + $0x10] sm:$0xff] %vm80_vm0, %v2701_v34 }
0x15a5   :  { %v2706_v35 = vld [vmem:[#allocation2] sm:$0xff]  ;;  %v3236_v27 = vld [vmem:[#allocation7 + $0x10] sm:$0xff] }
0x15a6   :  { %2870 = vrot.lane.b32.xlu0 %v2706_v35, %s4558_s6  ;;  %4151 = vmatmul.mubr.msk.f32.vlgmr.msra.gmra.mrb[32].mxu0 %vm80_vm0, %v2706_v35 }
0x15a7   :  { %4162 = vmatmul.mubr.msk.f32.vlgmr.msra.gmra.mrb[40].mxu1 %vm80_vm0, %v2706_v35  ;;  %4403 = vmatpush3.bf16.msra.mxu0 %v5083_v8 }
0x15a8   :  { %4409 = vmatpush3.bf16.msra.mxu1 %v5094_v13  ;;  %4404 = vmatprep.subr.bf16.mxu0 %v4556_v41 }
0x15a9   :  { %4410 = vmatprep.subr.bf16.mxu1 %v4556_v41  ;;  %4172 = vmatprep.mubr.msk.f32.mxu0 %vm4557_vm2, %v4554_v3 }
0x15aa   :  { %4183 = vmatprep.mubr.msk.f32.mxu1 %vm4557_vm2, %v4554_v3 }
0x15ab   :  { %4406 = vmatpush3.bf16.msra.mxu0 %v5103_v15 }
0x15ac   :  { %4412 = vmatpush3.bf16.msra.mxu1 %v5107_v38  ;;  %4413 = vmatprep.subr.bf16.mxu0 %v4556_v41 }
0x15ad   :  { %4419 = vmatprep.subr.bf16.mxu1 %v4556_v41 }
0x1618   :  { %v2871_v59 = vpop.permute.xlu0 %2870 }
0x1679   :  { %v2776_v36 = vpop.f32.mrb[32].mxu0 }
0x167a   :  { %v2852_v39 = vadd.f32 %v2851_v37, %v2776_v36  ;;  %v2846_v40 = vpop.f32.mrb[40].mxu1  ;;  %v4152_v42 = vpop.f32.mrb[33].mxu0 }
0x167b   :  { %v4163_v43 = vpop.f32.mrb[41].mxu1  ;;  %v2847_v48 = vadd.f32 %v5134_v32, %v2846_v40 }
0x167c   :  { %v3619_v44 = vmul.f32 -1.442695, %v2852_v39 }
0x167e   :  { %4511 = vpow2.f32 %v3619_v44 }
0x1688   :  { %v4512_v45 = vpop.eup %4511 }
0x1689   :  { %v2856_v46 = vadd.f32 1.0, %v4512_v45 }
0x168b   :  { %4513 = vrcp.f32 %v2856_v46 }
0x1695   :  { %v4514_v49 = vpop.eup %4513 }
0x1696   :  { %v2861_v51 = vmul.f32 %v4514_v49, %v2847_v48  ;;  %v2864_v57 = vsub.f32 1.0, %v4514_v49  ;;  %v2873_v61 = vmul.f32 %v4514_v49, %v2871_v59  ;;  %v3212_v49 = vld [vmem:[#allocation6 + $0x28] sm:$0xff] }
0x1698   :  { %v2862_v54 = vadd.f32 %v2861_v51, %v2860_v52 }
0x169a   :  { %4515 = vtanh.f32 %v2862_v54 }
0x16a4   :  { %v4516_v55 = vpop.eup %4515 }
0x16a5   :  { %2866 = vrot.lane.b32.xlu1 %v4516_v55, %s4558_s6 }
0x1717   :  { %v2867_v60 = vpop.permute.xlu1 %2866 }
0x1718   :  { %v2869_v62 = vmul.f32 %v2867_v60, %v2864_v57 }
0x171a   :  { %v2874_v63 = vadd.f32 %v2873_v61, %v2869_v62 }
0x171c   :  { %2876 = vrot.lane.b32.xlu1 %v2874_v63, %s4559_s9 }
0x178e   :  { %v2877_v0 = vpop.permute.xlu1 %2876 }
0x178f   :  { %2879 = vst.msk [vmem:[#allocation2] sm:$0xff] %vm80_vm0, %v2877_v0  ;;  %2881 = vst.msk [vmem:[#allocation7 + $0x18] sm:$0xff] %vm80_vm0, %v2877_v0 }
0x1796   :  { %v2882_v1 = vld [vmem:[#allocation2] sm:$0xff] }
0x1797   :  { %3046 = vrot.lane.b32.xlu1 %v2882_v1, %s4558_s6  ;;  %4173 = vmatmul.mubr.msk.f32.vlgmr.msra.gmra.mrb[34].mxu0 %vm80_vm0, %v2882_v1  ;;  %v3237_v29 = vld [vmem:[#allocation7 + $0x18] sm:$0xff] }
0x1798   :  { %4184 = vmatmul.mubr.msk.f32.vlgmr.msra.gmra.mrb[42].mxu1 %vm80_vm0, %v2882_v1  ;;  %4415 = vmatpush3.bf16.msra.mxu0 %v5083_v8  ;;  %v3429_v1 = vlaneseq }
0x1799   :  { %4421 = vmatpush3.bf16.msra.mxu1 %v5094_v13  ;;  %4416 = vmatprep.subr.bf16.mxu0 %v4556_v41 }
0x179a   :  { %4422 = vmatprep.subr.bf16.mxu1 %v4556_v41  ;;  %4194 = vmatprep.mubr.msk.f32.mxu0 %vm4557_vm2, %v4554_v3 }
0x179b   :  { %4205 = vmatprep.mubr.msk.f32.mxu1 %vm4557_vm2, %v4554_v3  ;;  %v3036_v3 = vld [vmem:[#allocation6 + $0x20] sm:$0xff] }
0x179c   :  { %4418 = vmatpush3.bf16.msra.mxu0 %v5103_v15 }
0x179d   :  { %4424 = vmatpush3.bf16.msra.mxu1 %v5107_v38  ;;  %v3240_v38 = vld [vmem:[%s5418_s17] sm:$0xff] }
0x179e   :  { %v4425_v16 = vpack.c.bf16 %v3241_v14, %v3240_v38 }
0x17a0   :  { %4426 = vmatprep.subr.bf16.mxu0 %v4425_v16 }
0x1809   :  { %v3047_v17 = vpop.permute.xlu1 %3046 }
0x186a   :  { %v2952_v2 = vpop.f32.mrb[34].mxu0 }
0x186b   :  { %v3028_v5 = vadd.f32 %v3027_v4, %v2952_v2  ;;  %v3022_v8 = vpop.f32.mrb[42].mxu1  ;;  %v4174_v12 = vpop.f32.mrb[35].mxu0  ;;  %v3430_v4 = vand.u32 127, %v3429_v1 }
0x186c   :  { %v4185_v13 = vpop.f32.mrb[43].mxu1  ;;  %v3023_v9 = vadd.f32 %v5134_v32, %v3022_v8 }
0x186d   :  { %v3622_v6 = vmul.f32 -1.442695, %v3028_v5 }
0x186f   :  { %4517 = vpow2.f32 %v3622_v6 }
0x1879   :  { %v4518_v7 = vpop.eup %4517 }
0x187a   :  { %v3032_v41 = vadd.f32 1.0, %v4518_v7 }
0x187c   :  { %4519 = vrcp.f32 %v3032_v41 }
0x1886   :  { %v4520_v10 = vpop.eup %4519 }
0x1887   :  { %v3037_v11 = vmul.f32 %v4520_v10, %v3023_v9  ;;  %v3040_v53 = vsub.f32 1.0, %v4520_v10  ;;  %v3049_v19 = vmul.f32 %v4520_v10, %v3047_v17 }
0x1889   :  { %v3038_v28 = vadd.f32 %v3037_v11, %v3036_v3 }
0x188b   :  { %4521 = vtanh.f32 %v3038_v28 }
0x1895   :  { %v4522_v15 = vpop.eup %4521 }
0x1896   :  { %3042 = vrot.lane.b32.xlu0 %v4522_v15, %s4558_s6 }
0x1908   :  { %v3043_v18 = vpop.permute.xlu0 %3042 }
0x1909   :  { %v3045_v20 = vmul.f32 %v3043_v18, %v3040_v53 }
0x190b   :  { %v3050_v21 = vadd.f32 %v3049_v19, %v3045_v20 }
0x190d   :  { %3052 = vrot.lane.b32.xlu0 %v3050_v21, %s4559_s9 }
0x197f   :  { %v3053_v22 = vpop.permute.xlu0 %3052 }
0x1980   :  { %3055 = vst.msk [vmem:[#allocation2] sm:$0xff] %vm80_vm0, %v3053_v22  ;;  %3057 = vst.msk [vmem:[#allocation7 + $0x20] sm:$0xff] %vm80_vm0, %v3053_v22 }
0x1987   :  { %v3058_v25 = vld [vmem:[#allocation2] sm:$0xff]  ;;  %v3238_v30 = vld [vmem:[#allocation7 + $0x20] sm:$0xff] }
0x1988   :  { %3222 = vrot.lane.b32.xlu0 %v3058_v25, %s4558_s6  ;;  %4195 = vmatmul.mubr.msk.f32.vlgmr.msra.gmra.mrb[36].mxu0 %vm80_vm0, %v3058_v25 }
0x1989   :  { %4206 = vmatmul.mubr.msk.f32.vlgmr.msra.gmra.mrb[44].mxu1 %vm80_vm0, %v3058_v25  ;;  %4428 = vmatpush3.bf16.msra.mxu0 %v4425_v16 }
0x198a   :  { %4216 = vmatprep.mubr.msk.f32.mxu0 %vm80_vm0, %v3234_v56  ;;  %4430 = vmatprep.subr.bf16.mxu0 %v4429_v47 }
0x198d   :  { %4432 = vmatpush3.bf16.msra.mxu0 %v4429_v47 }
0x1990   :  { %4217 = vmatmul.mubr.msk.f32.vlgmr.msra.gmra.mrb[38].mxu0 %vm80_vm0, %v3235_v26 }
0x1991   :  { %4219 = vmatprep.mubr.msk.f32.mxu0 %vm80_vm0, %v3236_v27 }
0x1994   :  { %4220 = vmatmul.mubr.msk.f32.gmra.mrb[40].mxu0 %vm80_vm0, %v3237_v29 }
0x1995   :  { %4222 = vmatprep.mubr.msk.f32.mxu0 %vm80_vm0, %v3238_v30 }
0x19fa   :  { %v3223_v55 = vpop.permute.xlu0 %3222 }
0x1a5b   :  { %v3128_v31 = vpop.f32.mrb[36].mxu0 }
0x1a5c   :  { %v3204_v58 = vadd.f32 %v3203_v50, %v3128_v31  ;;  %v3198_v33 = vpop.f32.mrb[44].mxu1  ;;  %v4196_v34 = vpop.f32.mrb[37].mxu0 }
0x1a5d   :  { %v4207_v35 = vpop.f32.mrb[45].mxu1  ;;  %v3199_v45 = vadd.f32 %v5134_v32, %v3198_v33 }
0x1a5e   :  { %v3625_v36 = vmul.f32 -1.442695, %v3204_v58 }
0x1a60   :  { %4523 = vpow2.f32 %v3625_v36 }
0x1a63   :  { %v5239_v37 = vpop.f32.mrb[38].mxu0 }
0x1a64   :  { %v5241_v39 = vpop.f32.mrb[39].mxu0 }
0x1a65   :  { %3357 = vmax.xlane.f32.xlu0 %v5241_v39 }
0x1a67   :  { %v5244_v40 = vpop.f32.mrb[40].mxu0 }
0x1a68   :  { %v5246_v42 = vpop.f32.mrb[41].mxu0 }
0x1a69   :  { %3361 = vmax.xlane.f32.xlu0 %v5246_v42 }
0x1a6a   :  { %v4524_v43 = vpop.eup %4523 }
0x1a6b   :  { %v3208_v44 = vadd.f32 1.0, %v4524_v43 }
0x1a6d   :  { %4525 = vrcp.f32 %v3208_v44  ;;  %3363 = vmax.xlane.f32.xlu0 %v5244_v40 }
0x1a77   :  { %v4526_v46 = vpop.eup %4525 }
0x1a78   :  { %v3213_v48 = vmul.f32 %v4526_v46, %v3199_v45  ;;  %v3216_v54 = vsub.f32 1.0, %v4526_v46  ;;  %v3225_v59 = vmul.f32 %v4526_v46, %v3223_v55 }
0x1a7a   :  { %v3214_v51 = vadd.f32 %v3213_v48, %v3212_v49 }
0x1a7c   :  { %4527 = vtanh.f32 %v3214_v51 }
0x1a86   :  { %v4528_v52 = vpop.eup %4527 }
0x1a87   :  { %3218 = vrot.lane.b32.xlu1 %v4528_v52, %s4558_s6 }
0x1af2   :  { %v5257_v63 = vpop.xlane.xlu0 %3357 }
0x1af3   :  { %vm3431_vm12 = vcmp.eq.f32.partialorder %v5241_v39, %v5257_v63  ;;  %v3369_v53 = vsub.f32 %v5241_v39, %v5257_v63 }
0x1af4   :  { %v5273_v12 = vsel %vm3431_vm12, %v3430_v4, 128 }
0x1af5   :  { %v3444_v7 = vshra.s32 %v5273_v12, 16  ;;  %v3375_v19 = vmul.f32 1.442695, %v3369_v53  ;;  %v3443_v46 = vand.u32 65535, %v5273_v12 }
0x1af6   :  { %v5259_v0 = vpop.xlane.xlu0 %3361 }
0x1af7   :  { %vm3433_vm14 = vcmp.eq.f32.partialorder %v5246_v42, %v5259_v0  ;;  %v5292_v28 = vcvt.s32.f32 %v3444_v7  ;;  %v3371_v20 = vsub.f32 %v5246_v42, %v5259_v0 }
0x1af8   :  { %v5286_v10 = vsel %vm3433_vm14, %v3430_v4, 128 }
0x1af9   :  { %v3219_v57 = vpop.permute.xlu1 %3218  ;;  %v3472_v15 = vshra.s32 %v5286_v10, 16  ;;  %v3379_v23 = vmul.f32 1.442695, %v3371_v20 }
0x1afa   :  { %v3221_v60 = vmul.f32 %v3219_v57, %v3216_v54  ;;  %v5267_v5 = vpop.xlane.xlu0 %3363  ;;  %v3445_v57 = vcvt.s32.f32 %v3443_v46 }
0x1afb   :  { %vm3434_vm13 = vcmp.eq.f32.partialorder %v5244_v40, %v5267_v5  ;;  %v5299_v14 = vcvt.s32.f32 %v3472_v15  ;;  %v3372_v17 = vsub.f32 %v5244_v40, %v5267_v5 }
0x1afc   :  { %v3226_v61 = vadd.f32 %v3225_v59, %v3221_v60  ;;  %v5281_v41 = vsel %vm3434_vm13, %v3430_v4, 128  ;;  %v3471_v59 = vand.u32 65535, %v5286_v10 }
0x1afd   :  { %v3486_v3 = vshra.s32 %v5281_v41, 16  ;;  %v3381_v21 = vmul.f32 1.442695, %v3372_v17  ;;  %v3485_v54 = vand.u32 65535, %v5281_v41 }
0x1afe   :  { %3228 = vrot.lane.b32.xlu1 %v3226_v61, %s4559_s9 }
0x1aff   :  { %v5297_v38 = vcvt.s32.f32 %v3486_v3 }
0x1b22   :  { %3359 = vmax.xlane.f32.xlu1 %v5239_v37 }
0x1b70   :  { %v3229_v62 = vpop.permute.xlu1 %3228 }
0x1b71   :  { %3231 = vst.msk [vmem:[#allocation2] sm:$0xff] %vm80_vm0, %v3229_v62  ;;  %3233 = vst.msk [vmem:[#allocation7 + $0x28] sm:$0xff] %vm80_vm0, %v3229_v62  ;;  %v3487_v62 = vcvt.s32.f32 %v3485_v54 }
0x1b78   :  { %v3239_v32 = vld [vmem:[#allocation7 + $0x28] sm:$0xff] }
0x1b79   :  { %4223 = vmatmul.mubr.msk.f32.gmra.mrb[42].mxu0 %vm80_vm0, %v3239_v32  ;;  %v3473_v32 = vcvt.s32.f32 %v3471_v59 }
0x1baf   :  { %v5261_v2 = vpop.xlane.xlu1 %3359 }
0x1bb0   :  { %vm3432_vm11 = vcmp.eq.f32.partialorder %v5239_v37, %v5261_v2  ;;  %v3370_v16 = vsub.f32 %v5239_v37, %v5261_v2 }
0x1bb1   :  { %v5269_v8 = vsel %vm3432_vm11, %v3430_v4, 128 }
0x1bb2   :  { %v3458_v13 = vshra.s32 %v5269_v8, 16  ;;  %v3377_v18 = vmul.f32 1.442695, %v3370_v16  ;;  %v3457_v45 = vand.u32 65535, %v5269_v8 }
0x1bb4   :  { %v5289_v11 = vcvt.s32.f32 %v3458_v13  ;;  %4529 = vpow2.f32 %v3377_v18  ;;  %v3459_v52 = vcvt.s32.f32 %v3457_v45 }
0x1bb5   :  { %4531 = vpow2.f32 %v3375_v19 }
0x1bb6   :  { %4533 = vpow2.f32 %v3381_v21 }
0x1bb7   :  { %4535 = vpow2.f32 %v3379_v23 }
0x1bbe   :  { %v4530_v33 = vpop.eup %4529 }
0x1bbf   :  { %v4532_v34 = vpop.eup %4531 }
0x1bc0   :  { %v4534_v35 = vpop.eup %4533 }
0x1bc1   :  { %v4536_v43 = vpop.eup %4535 }
0x1c4c   :  { %v5278_v6 = vpop.f32.mrb[42].mxu0 }
0x1c4d   :  { %3367 = vmax.xlane.f32.xlu0 %v5278_v6  ;;  %v5284_v9 = vpop.f32.mrb[43].mxu0 }
0x1c4e   :  { %3365 = vmax.xlane.f32.xlu1 %v5284_v9 }
0x1c51   :  { %3461 = vmin.xlane.f32.xlu0 %v5289_v11 }
0x1c52   :  { %3447 = vmin.xlane.f32.xlu1 %v5292_v28 }
0x1c55   :  { %3489 = vmin.xlane.f32.xlu0 %v5297_v38 }
0x1c56   :  { %3475 = vmin.xlane.f32.xlu1 %v5299_v14 }
0x1cda   :  { %v5311_v22 = vpop.xlane.xlu0 %3367 }
0x1cdb   :  { %v3374_v24 = vsub.f32 %v5278_v6, %v5311_v22  ;;  %vm3436_vm15 = vcmp.eq.f32.partialorder %v5278_v6, %v5311_v22  ;;  %v5317_v47 = vpop.xlane.xlu1 %3365 }
0x1cdc   :  { %v3373_v25 = vsub.f32 %v5284_v9, %v5317_v47  ;;  %vm3435_vm0 = vcmp.eq.f32.partialorder %v5284_v9, %v5317_v47  ;;  %v3442_v56 = vsel %vm3436_vm15, %v3430_v4, 128 }
0x1cdd   :  { %v3514_v26 = vshra.s32 %v3442_v56, 16  ;;  %v3441_v27 = vsel %vm3435_vm0, %v3430_v4, 128  ;;  %v3385_v29 = vmul.f32 1.442695, %v3374_v24  ;;  %v3513_v8 = vand.u32 65535, %v3442_v56 }
0x1cde   :  { %v3500_v30 = vshra.s32 %v3441_v27, 16  ;;  %v3383_v31 = vmul.f32 1.442695, %v3373_v25  ;;  %v3462_v36 = vpop.xlane.xlu0 %3461  ;;  %v3499_v12 = vand.u32 65535, %v3441_v27 }
0x1cdf   :  { %v3516_v50 = vcvt.s32.f32 %v3514_v26  ;;  %4537 = vpow2.f32 %v3385_v29  ;;  %v3448_v44 = vpop.xlane.xlu1 %3447  ;;  %vm3463_vm1 = vcmp.eq.f32.partialorder %v5289_v11, %v3462_v36  ;;  %v3515_v7 = vcvt.s32.f32 %v3513_v8 }
0x1ce0   :  { %v3502_v58 = vcvt.s32.f32 %v3500_v30  ;;  %4539 = vpow2.f32 %v3383_v31  ;;  %vm3449_vm2 = vcmp.eq.f32.partialorder %v5292_v28, %v3448_v44  ;;  %v3464_v60 = vsel %vm3463_vm1, %v3459_v52, inf }
0x1ce1   :  { %3517 = vmin.xlane.f32.xlu0 %v3516_v50  ;;  %v3450_v61 = vsel %vm3449_vm2, %v3445_v57, inf  ;;  %v3501_v10 = vcvt.s32.f32 %v3499_v12  ;;  %v3468_v16 = vcvt.f32.s32 %v3462_v36  ;;  %v3454_v17 = vcvt.f32.s32 %v3448_v44 }
0x1ce2   :  { %3503 = vmin.xlane.f32.xlu1 %v3502_v58  ;;  %v5326_v51 = vpop.xlane.xlu0 %3489 }
0x1ce3   :  { %v5330_v55 = vpop.xlane.xlu1 %3475  ;;  %vm3491_vm3 = vcmp.eq.f32.partialorder %v5297_v38, %v5326_v51  ;;  %v3469_v21 = vshll.u32 %v3468_v16, 16  ;;  %v3455_v25 = vshll.u32 %v3454_v17, 16  ;;  %v3496_v56 = vcvt.f32.s32 %v5326_v51 }
0x1ce4   :  { %vm3477_vm4 = vcmp.eq.f32.partialorder %v5299_v14, %v5330_v55  ;;  %v3492_v1 = vsel %vm3491_vm3, %v3487_v62, inf  ;;  %v3482_v30 = vcvt.f32.s32 %v5330_v55 }
0x1ce5   :  { %3389 = vadd.xlane.f32.xlu0 %v4530_v33  ;;  %v3478_v4 = vsel %vm3477_vm4, %v3473_v32, inf  ;;  %v3497_v46 = vshll.u32 %v3496_v56, 16 }
0x1ce6   :  { %3387 = vadd.xlane.f32.xlu1 %v4532_v34  ;;  %v3483_v52 = vshll.u32 %v3482_v30, 16 }
0x1ce9   :  { %3393 = vadd.xlane.f32.xlu0 %v4534_v35  ;;  %v4538_v48 = vpop.eup %4537 }
0x1cea   :  { %3391 = vadd.xlane.f32.xlu1 %v4536_v43  ;;  %v4540_v49 = vpop.eup %4539 }
0x1ced   :  { %3397 = vadd.xlane.f32.xlu0 %v4538_v48 }
0x1cee   :  { %3395 = vadd.xlane.f32.xlu1 %v4540_v49 }
0x1cf1   :  { %3465 = vmin.xlane.f32.xlu0 %v3464_v60 }
0x1cf2   :  { %3451 = vmin.xlane.f32.xlu1 %v3450_v61 }
0x1cf5   :  { %3493 = vmin.xlane.f32.xlu0 %v3492_v1 }
0x1cf6   :  { %3479 = vmin.xlane.f32.xlu1 %v3478_v4 }
0x1d6e   :  { %v5337_v13 = vpop.xlane.xlu0 %3517 }
0x1d6f   :  { %v5339_v41 = vpop.xlane.xlu1 %3503  ;;  %vm3519_vm5 = vcmp.eq.f32.partialorder %v3516_v50, %v5337_v13 }
0x1d70   :  { %v3520_v11 = vsel %vm3519_vm5, %v3515_v7, inf  ;;  %vm3505_vm6 = vcmp.eq.f32.partialorder %v3502_v58, %v5339_v41  ;;  %v3510_v1 = vcvt.f32.s32 %v5339_v41 }
0x1d71   :  { %3521 = vmin.xlane.f32.xlu0 %v3520_v11  ;;  %v3506_v3 = vsel %vm3505_vm6, %v3501_v10, inf }
0x1d72   :  { %v3390_v28 = vpop.xlane.xlu0 %3389  ;;  %3507 = vmin.xlane.f32.xlu1 %v3506_v3  ;;  %v3511_v7 = vshll.u32 %v3510_v1, 16 }
0x1d73   :  { %4541 = vlog2.f32 %v3390_v28  ;;  %v3388_v15 = vpop.xlane.xlu1 %3387 }
0x1d74   :  { %4543 = vlog2.f32 %v3388_v15 }
0x1d76   :  { %v3394_v38 = vpop.xlane.xlu0 %3393 }
0x1d77   :  { %4545 = vlog2.f32 %v3394_v38  ;;  %v3392_v14 = vpop.xlane.xlu1 %3391 }
0x1d78   :  { %4547 = vlog2.f32 %v3392_v14 }
0x1d7a   :  { %v3398_v53 = vpop.xlane.xlu0 %3397 }
0x1d7b   :  { %4549 = vlog2.f32 %v3398_v53  ;;  %v3396_v18 = vpop.xlane.xlu1 %3395 }
0x1d7c   :  { %4551 = vlog2.f32 %v3396_v18 }
0x1d7d   :  { %v4542_v19 = vpop.eup %4541 }
0x1d7e   :  { %v4544_v20 = vpop.eup %4543  ;;  %v3402_v23 = vmul.f32 0.6931472, %v4542_v19  ;;  %v3466_v24 = vpop.xlane.xlu0 %3465 }
0x1d7f   :  { %v3400_v26 = vmul.f32 0.6931472, %v4544_v20  ;;  %v3467_v27 = vcvt.f32.s32 %v3466_v24  ;;  %v3452_v29 = vpop.xlane.xlu1 %3451 }
0x1d80   :  { %v3412_v31 = vadd.f32 %v3402_v23, %v5261_v2  ;;  %v3453_v50 = vcvt.f32.s32 %v3452_v29 }
0x1d81   :  { %v4546_v58 = vpop.eup %4545  ;;  %v3411_v33 = vadd.f32 %v3400_v26, %v5257_v63  ;;  %v3470_v34 = vadd.s32 %v3469_v21, %v3467_v27 }
0x1d82   :  { %v4548_v35 = vpop.eup %4547  ;;  %v3418_v36 = vsub.f32 %v5239_v37, %v3412_v31  ;;  %v3406_v43 = vmul.f32 0.6931472, %v4546_v58  ;;  %v3456_v44 = vadd.s32 %v3455_v25, %v3453_v50  ;;  %v3494_v45 = vpop.xlane.xlu0 %3493 }
0x1d83   :  { %v3417_v48 = vsub.f32 %v5241_v39, %v3411_v33  ;;  %v3404_v49 = vmul.f32 0.6931472, %v4548_v35  ;;  %3529 = vst.msk [vmem:[%s5419_s19 + $0x8] sm:$0xff] %vm3527_vm7, %v3470_v34  ;;  %v3495_v2 = vcvt.f32.s32 %v3494_v45  ;;  %v3480_v51 = vpop.xlane.xlu1 %3479 }
0x1d84   :  { %3424 = vst [vmem:[%s5420_s18 + $0x8] sm:$0xff] %v3418_v36  ;;  %v3414_v37 = vadd.f32 %v3406_v43, %v5267_v5  ;;  %3528 = vst.msk [vmem:[%s5419_s19] sm:$0xff] %vm3527_vm7, %v3456_v44  ;;  %v3481_v39 = vcvt.f32.s32 %v3480_v51 }
0x1d85   :  { %v4550_v63 = vpop.eup %4549  ;;  %3423 = vst [vmem:[%s5420_s18] sm:$0xff] %v3417_v48  ;;  %v3413_v54 = vadd.f32 %v3404_v49, %v5259_v0  ;;  %v3498_v55 = vadd.s32 %v3497_v46, %v3495_v2 }
0x1d86   :  { %v4552_v57 = vpop.eup %4551  ;;  %v3420_v59 = vsub.f32 %v5244_v40, %v3414_v37  ;;  %v3410_v60 = vmul.f32 0.6931472, %v4550_v63  ;;  %v3484_v61 = vadd.s32 %v3483_v52, %v3481_v39 }
0x1d87   :  { %v3419_v5 = vsub.f32 %v5246_v42, %v3413_v54  ;;  %v3408_v62 = vmul.f32 0.6931472, %v4552_v57  ;;  %3531 = vst.msk [vmem:[%s5419_s19 + $0x18] sm:$0xff] %vm3527_vm7, %v3498_v55 }
0x1d88   :  { %3426 = vst [vmem:[%s5420_s18 + $0x18] sm:$0xff] %v3420_v59  ;;  %v3416_v0 = vadd.f32 %v3410_v60, %v5311_v22  ;;  %3530 = vst.msk [vmem:[%s5419_s19 + $0x10] sm:$0xff] %vm3527_vm7, %v3484_v61  ;;  %v3524_v22 = vcvt.f32.s32 %v5337_v13 }
0x1d89   :  { %3425 = vst [vmem:[%s5420_s18 + $0x10] sm:$0xff] %v3419_v5  ;;  %v3415_v40 = vadd.f32 %v3408_v62, %v5317_v47 }
0x1d8a   :  { %v3422_v42 = vsub.f32 %v5278_v6, %v3416_v0  ;;  %v3525_v8 = vshll.u32 %v3524_v22, 16 }
0x1d8b   :  { %v3421_v32 = vsub.f32 %v5284_v9, %v3415_v40 }
0x1d8c   :  { %3428 = vst [vmem:[%s5420_s18 + $0x28] sm:$0xff] %v3422_v42 }
0x1d8d   :  { %3427 = vst [vmem:[%s5420_s18 + $0x20] sm:$0xff] %v3421_v32 }
0x1dfe   :  { %v3522_v4 = vpop.xlane.xlu0 %3521 }
0x1dff   :  { %v3523_v12 = vcvt.f32.s32 %v3522_v4  ;;  %v3508_v47 = vpop.xlane.xlu1 %3507 }
0x1e00   :  { %v3509_v6 = vcvt.f32.s32 %v3508_v47 }
0x1e01   :  { %v3526_v10 = vadd.s32 %v3525_v8, %v3523_v12 }
0x1e02   :  { %v3512_v9 = vadd.s32 %v3511_v7, %v3509_v6 }
0x1e03   :  { %3533 = vst.msk [vmem:[%s5419_s19 + $0x28] sm:$0xff] %vm3527_vm7, %v3526_v10 }
0x1e04   :  { %3532 = vst.msk [vmem:[%s5419_s19 + $0x20] sm:$0xff] %vm3527_vm7, %v3512_v9 }

</bundles_post_ra>
